<compile_context>
chip_gen: v5e
topology: v5e:2x2
jax: 0.10.0
libtpu: 0.0.40
codegen_flags: <defaults>
</compile_context>

<pallas_src>
import functools
import math

import jax
import jax.numpy as jnp
from jax import lax
from jax.experimental import pallas as pl
from jax.experimental.pallas import tpu as pltpu

EPS = 1e-12  # BERT layer_norm_eps default
_VMEM_LIMIT = 48 * 1024 * 1024  # safe on v5e/v6e (128 MiB) and v7x (64 MiB)


def _pick_tile(dim, candidates):
    """Largest aligned tile that evenly divides `dim`, else the full dim."""
    for c in candidates:
        if dim >= c and dim % c == 0:
            return c
    return dim


# ----------------------------- Pallas kernels ------------------------------

def _matmul_bias_kernel(x_ref, w_ref, b_ref, o_ref, acc_ref, *, activation):
    # K-tiled matmul with f32 accumulator; bias (+ optional exact GELU) epilogue.
    @pl.when(pl.program_id(2) == 0)
    def _():
        acc_ref[...] = jnp.zeros_like(acc_ref)

    acc_ref[...] += jnp.dot(x_ref[...].astype(jnp.bfloat16), w_ref[...],
                            preferred_element_type=jnp.float32)

    @pl.when(pl.program_id(2) == pl.num_programs(2) - 1)
    def _():
        y = acc_ref[...] + b_ref[...]
        if activation == "gelu":
            # exact (erf) GELU, HF BERT default hidden_act="gelu"
            y = 0.5 * y * (1.0 + lax.erf(y * 0.7071067811865476))
        o_ref[...] = y.astype(o_ref.dtype)


def _matmul_add_ln_kernel(x_ref, w_ref, b_ref, r_ref, g_ref, bt_ref, o_ref,
                          acc_ref, *, eps):
    # Matmul with fused epilogue: + bias + residual, then LayerNorm over full N.
    @pl.when(pl.program_id(1) == 0)
    def _():
        acc_ref[...] = jnp.zeros_like(acc_ref)

    acc_ref[...] += jnp.dot(x_ref[...].astype(jnp.bfloat16), w_ref[...],
                            preferred_element_type=jnp.float32)

    @pl.when(pl.program_id(1) == pl.num_programs(1) - 1)
    def _():
        y = acc_ref[...] + b_ref[...] + r_ref[...]
        mean = jnp.mean(y, axis=-1, keepdims=True)
        var = jnp.mean(jnp.square(y - mean), axis=-1, keepdims=True)
        yn = (y - mean) * lax.rsqrt(var + eps)
        o_ref[...] = (yn * g_ref[...] + bt_ref[...]).astype(o_ref.dtype)


def _emb_ln_kernel(x_ref, pos_ref, g_ref, b_ref, o_ref, *, eps):
    # Fused (inputs_embeds + position_emb + token_type_emb) -> LayerNorm.
    y = x_ref[...] + pos_ref[...]
    mean = jnp.mean(y, axis=-1, keepdims=True)
    var = jnp.mean(jnp.square(y - mean), axis=-1, keepdims=True)
    yn = (y - mean) * lax.rsqrt(var + eps)
    o_ref[...] = (yn * g_ref[...] + b_ref[...]).astype(o_ref.dtype)


def _attention_kernel(qkv_ref, o_ref, *, nh, hd, scale):
    # Per-batch attention over the fused (S, 3D) QKV slab; static loop over heads.
    D = nh * hd
    ctxs = []
    for h in range(nh):
        q = qkv_ref[0, :, h * hd:(h + 1) * hd]                  # (S, hd) bf16
        k = qkv_ref[0, :, D + h * hd:D + (h + 1) * hd]          # (S, hd) bf16
        v = qkv_ref[0, :, 2 * D + h * hd:2 * D + (h + 1) * hd]  # (S, hd) bf16
        # contract last dims directly (no k.T transpose through the XLU)
        s = lax.dot_general(q, k, (((1,), (1,)), ((), ())),
                            preferred_element_type=jnp.float32) * scale  # (S, S)
        s = s - jnp.max(s, axis=-1, keepdims=True)
        p = jnp.exp(s)
        p = p * pl.reciprocal(jnp.sum(p, axis=-1, keepdims=True), approx=True)
        ctx = jnp.dot(p.astype(v.dtype), v,
                      preferred_element_type=jnp.float32)        # (S, hd) f32
        ctxs.append(ctx)
    o_ref[0] = jnp.concatenate(ctxs, axis=-1).astype(o_ref.dtype)


def _pool_fc_kernel(h_ref, w_ref, b_ref, o_ref):
    pooled = jnp.mean(h_ref[...], axis=1)                        # (bt, D) f32
    o_ref[...] = (jnp.dot(pooled.astype(jnp.bfloat16), w_ref[...],
                          preferred_element_type=jnp.float32)
                  + b_ref[...]).astype(o_ref.dtype)


# ------------------------------ pallas_call wrappers ------------------------

def linear(x2d, w, b, activation=None, out_dtype=jnp.float32):
    M, K = x2d.shape
    N = w.shape[1]
    tm = _pick_tile(M, (512, 256, 128))
    tn = _pick_tile(N, (512, 256, 128))
    tk = _pick_tile(K, (1024, 512, 256))
    return pl.pallas_call(
        functools.partial(_matmul_bias_kernel, activation=activation),
        out_shape=jax.ShapeDtypeStruct((M, N), out_dtype),
        grid=(M // tm, N // tn, K // tk),
        in_specs=[pl.BlockSpec((tm, tk), lambda i, j, k: (i, k)),
                  pl.BlockSpec((tk, tn), lambda i, j, k: (k, j)),
                  pl.BlockSpec((1, tn), lambda i, j, k: (0, j))],
        out_specs=pl.BlockSpec((tm, tn), lambda i, j, k: (i, j)),
        scratch_shapes=[pltpu.VMEM((tm, tn), jnp.float32)],
        compiler_params=pltpu.CompilerParams(
            dimension_semantics=("parallel", "parallel", "arbitrary"),
            vmem_limit_bytes=_VMEM_LIMIT),
    )(x2d, w, b)


def linear_add_layernorm(x2d, w, b, residual, gamma, beta, eps=EPS):
    M, K = x2d.shape
    N = w.shape[1]
    tm = _pick_tile(M, (256, 128))
    tk = _pick_tile(K, (512, 256))
    return pl.pallas_call(
        functools.partial(_matmul_add_ln_kernel, eps=eps),
        out_shape=jax.ShapeDtypeStruct((M, N), jnp.float32),
        grid=(M // tm, K // tk),
        in_specs=[pl.BlockSpec((tm, tk), lambda i, k: (i, k)),
                  pl.BlockSpec((tk, N), lambda i, k: (k, 0)),
                  pl.BlockSpec((1, N), lambda i, k: (0, 0)),
                  pl.BlockSpec((tm, N), lambda i, k: (i, 0)),
                  pl.BlockSpec((1, N), lambda i, k: (0, 0)),
                  pl.BlockSpec((1, N), lambda i, k: (0, 0))],
        out_specs=pl.BlockSpec((tm, N), lambda i, k: (i, 0)),
        scratch_shapes=[pltpu.VMEM((tm, N), jnp.float32)],
        compiler_params=pltpu.CompilerParams(
            dimension_semantics=("parallel", "arbitrary"),
            vmem_limit_bytes=_VMEM_LIMIT),
    )(x2d, w, b, residual, gamma, beta)


def emb_add_layernorm(x2d, pos_tok, gamma, beta, seq_len, eps=EPS):
    M, D = x2d.shape
    B = M // seq_len
    return pl.pallas_call(
        functools.partial(_emb_ln_kernel, eps=eps),
        out_shape=jax.ShapeDtypeStruct((M, D), jnp.float32),
        grid=(B,),
        in_specs=[pl.BlockSpec((seq_len, D), lambda b: (b, 0)),
                  pl.BlockSpec((seq_len, D), lambda b: (0, 0)),
                  pl.BlockSpec((1, D), lambda b: (0, 0)),
                  pl.BlockSpec((1, D), lambda b: (0, 0))],
        out_specs=pl.BlockSpec((seq_len, D), lambda b: (b, 0)),
        compiler_params=pltpu.CompilerParams(dimension_semantics=("parallel",)),
    )(x2d, pos_tok, gamma, beta)


def attention(qkv3d, nh, hd, scale):
    B, S, threeD = qkv3d.shape
    D = nh * hd
    return pl.pallas_call(
        functools.partial(_attention_kernel, nh=nh, hd=hd, scale=scale),
        out_shape=jax.ShapeDtypeStruct((B, S, D), jnp.bfloat16),
        grid=(B,),
        in_specs=[pl.BlockSpec((1, S, threeD), lambda b: (b, 0, 0))],
        out_specs=pl.BlockSpec((1, S, D), lambda b: (b, 0, 0)),
        compiler_params=pltpu.CompilerParams(dimension_semantics=("parallel",)),
    )(qkv3d)


def pool_fc(h3d, w, b):
    B, S, D = h3d.shape
    O = w.shape[1]
    bt = 8 if (B >= 8 and B % 8 == 0) else B
    return pl.pallas_call(
        _pool_fc_kernel,
        out_shape=jax.ShapeDtypeStruct((B, O), jnp.float32),
        grid=(B // bt,),
        in_specs=[pl.BlockSpec((bt, S, D), lambda i: (i, 0, 0)),
                  pl.BlockSpec((D, O), lambda i: (0, 0)),
                  pl.BlockSpec((1, O), lambda i: (0, 0))],
        out_specs=pl.BlockSpec((bt, O), lambda i: (i, 0)),
        compiler_params=pltpu.CompilerParams(dimension_semantics=("parallel",)),
    )(h3d, w, b)


# --------------------------- parameter construction -------------------------

def init_params(key, D, H, O, num_layers, num_heads, max_pos):
    std = 0.02
    bf16 = jnp.bfloat16
    keys = jax.random.split(key, 3 + num_layers)
    params = {
        "num_heads": num_heads,
        "pos_emb": (std * jax.random.normal(keys[0], (max_pos, D))).astype(jnp.float32),
        "tok_emb": (std * jax.random.normal(keys[1], (D,))).astype(jnp.float32),
        "emb_ln_g": jnp.ones((1, D), jnp.float32),
        "emb_ln_b": jnp.zeros((1, D), jnp.float32),
        "fc_w": (std * jax.random.normal(keys[2], (D, O))).astype(bf16),
        "fc_b": jnp.zeros((1, O), jnp.float32),
        "layers": [],
    }
    for l in range(num_layers):
        lk = jax.random.split(keys[3 + l], 6)
        wq = std * jax.random.normal(lk[0], (D, D))
        wk = std * jax.random.normal(lk[1], (D, D))
        wv = std * jax.random.normal(lk[2], (D, D))
        layer = {
            # fused QKV projection: (D, 3D) weight, (1, 3D) bias
            "w_qkv": jnp.concatenate([wq, wk, wv], axis=1).astype(bf16),
            "b_qkv": jnp.zeros((1, 3 * D), jnp.float32),
            "wo": (std * jax.random.normal(lk[3], (D, D))).astype(bf16),
            "bo": jnp.zeros((1, D), jnp.float32),
            "ln1_g": jnp.ones((1, D), jnp.float32),
            "ln1_b": jnp.zeros((1, D), jnp.float32),
            "wi": (std * jax.random.normal(lk[4], (D, H))).astype(bf16),
            "bi": jnp.zeros((1, H), jnp.float32),
            "wo2": (std * jax.random.normal(lk[5], (H, D))).astype(bf16),
            "bo2": jnp.zeros((1, D), jnp.float32),
            "ln2_g": jnp.ones((1, D), jnp.float32),
            "ln2_b": jnp.zeros((1, D), jnp.float32),
        }
        params["layers"].append(layer)
    return params


# --------------------------------- forward ----------------------------------

def bert_classification_forward(x, params):
    B, S, D = x.shape
    nh = params["num_heads"]
    hd = D // nh
    scale = 1.0 / math.sqrt(hd)

    # BertEmbeddings: inputs_embeds + position_emb + token_type_emb -> LayerNorm
    pos_tok = params["pos_emb"][:S] + params["tok_emb"][None, :]      # (S, D)
    h = emb_add_layernorm(x.reshape(B * S, D), pos_tok,
                          params["emb_ln_g"], params["emb_ln_b"], S)  # (B*S, D) f32

    for layer in params["layers"]:
        # fused QKV projection (bf16 output feeds attention's MXU directly)
        qkv = linear(h, layer["w_qkv"], layer["b_qkv"], out_dtype=jnp.bfloat16)
        # per-batch attention over the fused slab (no host-side head transposes)
        ctx = attention(qkv.reshape(B, S, 3 * D), nh, hd, scale)      # (B, S, D) bf16
        # BertSelfOutput: dense + residual + LN fused in one kernel
        h = linear_add_layernorm(ctx.reshape(B * S, D), layer["wo"], layer["bo"],
                                 h, layer["ln1_g"], layer["ln1_b"])
        # BertIntermediate (gelu) then BertOutput: dense + residual + LN fused
        inter = linear(h, layer["wi"], layer["bi"], activation="gelu",
                       out_dtype=jnp.bfloat16)
        h = linear_add_layernorm(inter, layer["wo2"], layer["bo2"],
                                 h, layer["ln2_g"], layer["ln2_b"])

    hidden = h.reshape(B, S, D)                                       # last_hidden_state
    logits = pool_fc(hidden, params["fc_w"], params["fc_b"])          # mean(dim=1) -> fc
    return logits


# ----------------------------------- main ------------------------------------

if __name__ == "__main__":
    B, S = 2, 8
    input_size = 32          # BERT hidden_size
    hidden_size = 64         # intermediate_size
    output_size = 4
    num_layers = 1
    num_heads = 2 if input_size % 2 == 0 else 1

    key = jax.random.PRNGKey(0)
    kx, kp = jax.random.split(key)
    x = jax.random.normal(kx, (B, S, input_size), jnp.float32)
    params = init_params(kp, input_size, hidden_size, output_size,
                         num_layers, num_heads, max_pos=S)

    fwd = jax.jit(lambda inp: bert_classification_forward(inp, params))
    out = fwd(x)
    jax.block_until_ready(out)
    assert out.shape == (B, output_size) and out.dtype == jnp.float32
    print("KERNEL_OK")
</pallas_src>

<mosaic_0001>
module attributes {stable_mosaic.version = 11 : i64} {
  func.func @_matmul_bias_kernel(%arg0: i32, %arg1: i32, %arg2: i32, %arg3: memref<16x32xf32, #tpu.memory_space<vmem>>, %arg4: memref<32x96xbf16, #tpu.memory_space<vmem>>, %arg5: memref<1x96xf32, #tpu.memory_space<vmem>>, %arg6: memref<16x96xbf16, #tpu.memory_space<vmem>>, %arg7: memref<16x96xf32, #tpu.memory_space<vmem>>) attributes {dimension_semantics = [#tpu.dimension_semantics<parallel>, #tpu.dimension_semantics<parallel>, #tpu.dimension_semantics<arbitrary>], iteration_bounds = array<i64: 1, 1, 1>, scalar_prefetch = 0 : i64, scratch_operands = 1 : i64, tpu.core_type = #tpu.core_type<tc>, window_params = [{transform_indices = @transform_0, window_bounds = array<i64: 16, 32>}, {transform_indices = @transform_1, window_bounds = array<i64: 32, 96>}, {transform_indices = @transform_2, window_bounds = array<i64: 1, 96>}, {transform_indices = @transform_3, window_bounds = array<i64: 16, 96>}]} {
    %c0_i32 = arith.constant 0 : i32
    %0 = arith.cmpi eq, %arg2, %c0_i32 : i32
    %1 = arith.extui %0 : i1 to i32
    %c0_i32_0 = arith.constant 0 : i32
    %2 = arith.cmpi ne, %1, %c0_i32_0 : i32
    scf.if %2 {
      %cst_10 = arith.constant 0.000000e+00 : f32
      %13 = vector.broadcast %cst_10 : f32 to vector<16x96xf32>
      %c0_11 = arith.constant 0 : index
      %c0_12 = arith.constant 0 : index
      %14 = vector.load %arg7[%c0_11, %c0_12] : memref<16x96xf32, #tpu.memory_space<vmem>>, vector<16x96xf32>
      tpu.vector_store %arg7[%c0_11, %c0_12], %13 {strides = array<i32>} : memref<16x96xf32, #tpu.memory_space<vmem>>, vector<16x96xf32>,
    } else {
    }
    %c0 = arith.constant 0 : index
    %c0_1 = arith.constant 0 : index
    %3 = vector.load %arg7[%c0, %c0_1] : memref<16x96xf32, #tpu.memory_space<vmem>>, vector<16x96xf32>
    %c0_2 = arith.constant 0 : index
    %c0_3 = arith.constant 0 : index
    %4 = vector.load %arg3[%c0_2, %c0_3] : memref<16x32xf32, #tpu.memory_space<vmem>>, vector<16x32xf32>
    %5 = arith.truncf %4 : vector<16x32xf32> to vector<16x32xbf16>
    %c0_4 = arith.constant 0 : index
    %c0_5 = arith.constant 0 : index
    %6 = vector.load %arg4[%c0_4, %c0_5] : memref<32x96xbf16, #tpu.memory_space<vmem>>, vector<32x96xbf16>
    %cst = arith.constant dense<0.000000e+00> : vector<16x96xf32>
    %7 = tpu.matmul %5, %6, %cst {dimension_numbers = #tpu.dot_dimension_numbers<[1], [0], [0], [1], [0, 0, 1, 1], [], []>} : vector<16x32xbf16>, vector<32x96xbf16>, vector<16x96xf32> -> vector<16x96xf32>
    %8 = arith.addf %3, %7 : vector<16x96xf32>
    %c0_6 = arith.constant 0 : index
    %c0_7 = arith.constant 0 : index
    %9 = vector.load %arg7[%c0_6, %c0_7] : memref<16x96xf32, #tpu.memory_space<vmem>>, vector<16x96xf32>
    tpu.vector_store %arg7[%c0_6, %c0_7], %8 {strides = array<i32>} : memref<16x96xf32, #tpu.memory_space<vmem>>, vector<16x96xf32>,
    %c0_i32_8 = arith.constant 0 : i32
    %10 = arith.cmpi eq, %arg2, %c0_i32_8 : i32
    %11 = arith.extui %10 : i1 to i32
    %c0_i32_9 = arith.constant 0 : i32
    %12 = arith.cmpi ne, %11, %c0_i32_9 : i32
    scf.if %12 {
      %c0_10 = arith.constant 0 : index
      %c0_11 = arith.constant 0 : index
      %13 = vector.load %arg7[%c0_10, %c0_11] : memref<16x96xf32, #tpu.memory_space<vmem>>, vector<16x96xf32>
      %c0_12 = arith.constant 0 : index
      %c0_13 = arith.constant 0 : index
      %14 = vector.load %arg5[%c0_12, %c0_13] : memref<1x96xf32, #tpu.memory_space<vmem>>, vector<1x96xf32>
      %15 = vector.broadcast %14 : vector<1x96xf32> to vector<16x96xf32>
      %16 = arith.addf %13, %15 : vector<16x96xf32>
      %17 = arith.truncf %16 : vector<16x96xf32> to vector<16x96xbf16>
      %c0_14 = arith.constant 0 : index
      %c0_15 = arith.constant 0 : index
      %18 = vector.load %arg6[%c0_14, %c0_15] : memref<16x96xbf16, #tpu.memory_space<vmem>>, vector<16x96xbf16>
      tpu.vector_store %arg6[%c0_14, %c0_15], %17 {strides = array<i32>} : memref<16x96xbf16, #tpu.memory_space<vmem>>, vector<16x96xbf16>,
    } else {
    }
    return
  }
  func.func @transform_0(%arg0: i32, %arg1: i32, %arg2: i32) -> (i32, i32) {
    %c0_i32 = arith.constant 0 : i32
    return %arg0, %arg2 : i32, i32
  }
  func.func @transform_1(%arg0: i32, %arg1: i32, %arg2: i32) -> (i32, i32) {
    %c0_i32 = arith.constant 0 : i32
    return %arg2, %arg1 : i32, i32
  }
  func.func @transform_2(%arg0: i32, %arg1: i32, %arg2: i32) -> (i32, i32) {
    %c0_i32 = arith.constant 0 : i32
    %c0_i32_0 = arith.constant 0 : i32
    return %c0_i32, %arg1 : i32, i32
  }
  func.func @transform_3(%arg0: i32, %arg1: i32, %arg2: i32) -> (i32, i32) {
    %c0_i32 = arith.constant 0 : i32
    return %arg0, %arg1 : i32, i32
  }
}

module attributes {stable_mosaic.version = 11 : i64} {
  func.func @_emb_ln_kernel(%arg0: i32, %arg1: memref<8x32xf32, #tpu.memory_space<vmem>>, %arg2: memref<8x32xf32, #tpu.memory_space<vmem>>, %arg3: memref<1x32xf32, #tpu.memory_space<vmem>>, %arg4: memref<1x32xf32, #tpu.memory_space<vmem>>, %arg5: memref<8x32xf32, #tpu.memory_space<vmem>>) attributes {dimension_semantics = [#tpu.dimension_semantics<parallel>], iteration_bounds = array<i64: 2>, scalar_prefetch = 0 : i64, scratch_operands = 0 : i64, tpu.core_type = #tpu.core_type<tc>, window_params = [{transform_indices = @transform_0, window_bounds = array<i64: 8, 32>}, {pipeline_mode = #tpu.pipeline_mode<synchronous>, transform_indices = @transform_1, window_bounds = array<i64: 8, 32>}, {pipeline_mode = #tpu.pipeline_mode<synchronous>, transform_indices = @transform_2, window_bounds = array<i64: 1, 32>}, {pipeline_mode = #tpu.pipeline_mode<synchronous>, transform_indices = @transform_3, window_bounds = array<i64: 1, 32>}, {transform_indices = @transform_4, window_bounds = array<i64: 8, 32>}]} {
    %c0 = arith.constant 0 : index
    %c0_0 = arith.constant 0 : index
    %0 = vector.load %arg1[%c0, %c0_0] : memref<8x32xf32, #tpu.memory_space<vmem>>, vector<8x32xf32>
    %c0_1 = arith.constant 0 : index
    %c0_2 = arith.constant 0 : index
    %1 = vector.load %arg2[%c0_1, %c0_2] : memref<8x32xf32, #tpu.memory_space<vmem>>, vector<8x32xf32>
    %2 = arith.addf %0, %1 : vector<8x32xf32>
    %cst = arith.constant dense<0.000000e+00> : vector<8xf32>
    %3 = vector.multi_reduction <add>, %2, %cst [1] : vector<8x32xf32> to vector<8xf32>
    %4 = vector.shape_cast %3 : vector<8xf32> to vector<8x1xf32>
    %cst_3 = arith.constant 3.200000e+01 : f32
    %5 = vector.broadcast %cst_3 : f32 to vector<8x1xf32>
    %6 = arith.divf %4, %5 : vector<8x1xf32>
    %7 = vector.broadcast %6 : vector<8x1xf32> to vector<8x32xf32>
    %8 = arith.subf %2, %7 : vector<8x32xf32>
    %9 = arith.mulf %8, %8 : vector<8x32xf32>
    %cst_4 = arith.constant dense<0.000000e+00> : vector<8xf32>
    %10 = vector.multi_reduction <add>, %9, %cst_4 [1] : vector<8x32xf32> to vector<8xf32>
    %11 = vector.shape_cast %10 : vector<8xf32> to vector<8x1xf32>
    %cst_5 = arith.constant 3.200000e+01 : f32
    %12 = vector.broadcast %cst_5 : f32 to vector<8x1xf32>
    %13 = arith.divf %11, %12 : vector<8x1xf32>
    %14 = vector.broadcast %6 : vector<8x1xf32> to vector<8x32xf32>
    %15 = arith.subf %2, %14 : vector<8x32xf32>
    %cst_6 = arith.constant 9.99999996E-13 : f32
    %16 = vector.broadcast %cst_6 : f32 to vector<8x1xf32>
    %17 = arith.addf %13, %16 : vector<8x1xf32>
    %18 = math.rsqrt %17 : vector<8x1xf32>
    %19 = vector.broadcast %18 : vector<8x1xf32> to vector<8x32xf32>
    %20 = arith.mulf %15, %19 : vector<8x32xf32>
    %c0_7 = arith.constant 0 : index
    %c0_8 = arith.constant 0 : index
    %21 = vector.load %arg3[%c0_7, %c0_8] : memref<1x32xf32, #tpu.memory_space<vmem>>, vector<1x32xf32>
    %22 = vector.broadcast %21 : vector<1x32xf32> to vector<8x32xf32>
    %23 = arith.mulf %20, %22 : vector<8x32xf32>
    %c0_9 = arith.constant 0 : index
    %c0_10 = arith.constant 0 : index
    %24 = vector.load %arg4[%c0_9, %c0_10] : memref<1x32xf32, #tpu.memory_space<vmem>>, vector<1x32xf32>
    %25 = vector.broadcast %24 : vector<1x32xf32> to vector<8x32xf32>
    %26 = arith.addf %23, %25 : vector<8x32xf32>
    %c0_11 = arith.constant 0 : index
    %c0_12 = arith.constant 0 : index
    %27 = vector.load %arg5[%c0_11, %c0_12] : memref<8x32xf32, #tpu.memory_space<vmem>>, vector<8x32xf32>
    tpu.vector_store %arg5[%c0_11, %c0_12], %26 {strides = array<i32>} : memref<8x32xf32, #tpu.memory_space<vmem>>, vector<8x32xf32>,
    return
  }
  func.func @transform_0(%arg0: i32) -> (i32, i32) {
    %c0_i32 = arith.constant 0 : i32
    %c0_i32_0 = arith.constant 0 : i32
    return %arg0, %c0_i32 : i32, i32
  }
  func.func @transform_1(%arg0: i32) -> (i32, i32) {
    %c0_i32 = arith.constant 0 : i32
    %c0_i32_0 = arith.constant 0 : i32
    %c0_i32_1 = arith.constant 0 : i32
    return %c0_i32, %c0_i32_0 : i32, i32
  }
  func.func @transform_2(%arg0: i32) -> (i32, i32) {
    %c0_i32 = arith.constant 0 : i32
    %c0_i32_0 = arith.constant 0 : i32
    %c0_i32_1 = arith.constant 0 : i32
    return %c0_i32, %c0_i32_0 : i32, i32
  }
  func.func @transform_3(%arg0: i32) -> (i32, i32) {
    %c0_i32 = arith.constant 0 : i32
    %c0_i32_0 = arith.constant 0 : i32
    %c0_i32_1 = arith.constant 0 : i32
    return %c0_i32, %c0_i32_0 : i32, i32
  }
  func.func @transform_4(%arg0: i32) -> (i32, i32) {
    %c0_i32 = arith.constant 0 : i32
    %c0_i32_0 = arith.constant 0 : i32
    return %arg0, %c0_i32 : i32, i32
  }
}

module attributes {stable_mosaic.version = 11 : i64} {
  func.func @_matmul_add_ln_kernel(%arg0: i32, %arg1: i32, %arg2: memref<16x32xbf16, #tpu.memory_space<vmem>>, %arg3: memref<32x32xbf16, #tpu.memory_space<vmem>>, %arg4: memref<1x32xf32, #tpu.memory_space<vmem>>, %arg5: memref<16x32xf32, #tpu.memory_space<vmem>>, %arg6: memref<1x32xf32, #tpu.memory_space<vmem>>, %arg7: memref<1x32xf32, #tpu.memory_space<vmem>>, %arg8: memref<16x32xf32, #tpu.memory_space<vmem>>, %arg9: memref<16x32xf32, #tpu.memory_space<vmem>>) attributes {dimension_semantics = [#tpu.dimension_semantics<parallel>, #tpu.dimension_semantics<arbitrary>], iteration_bounds = array<i64: 1, 1>, scalar_prefetch = 0 : i64, scratch_operands = 1 : i64, tpu.core_type = #tpu.core_type<tc>, window_params = [{transform_indices = @transform_0, window_bounds = array<i64: 16, 32>}, {transform_indices = @transform_1, window_bounds = array<i64: 32, 32>}, {pipeline_mode = #tpu.pipeline_mode<synchronous>, transform_indices = @transform_2, window_bounds = array<i64: 1, 32>}, {transform_indices = @transform_3, window_bounds = array<i64: 16, 32>}, {pipeline_mode = #tpu.pipeline_mode<synchronous>, transform_indices = @transform_4, window_bounds = array<i64: 1, 32>}, {pipeline_mode = #tpu.pipeline_mode<synchronous>, transform_indices = @transform_5, window_bounds = array<i64: 1, 32>}, {transform_indices = @transform_6, window_bounds = array<i64: 16, 32>}]} {
    %c0_i32 = arith.constant 0 : i32
    %0 = arith.cmpi eq, %arg1, %c0_i32 : i32
    %1 = arith.extui %0 : i1 to i32
    %c0_i32_0 = arith.constant 0 : i32
    %2 = arith.cmpi ne, %1, %c0_i32_0 : i32
    scf.if %2 {
      %cst_10 = arith.constant 0.000000e+00 : f32
      %12 = vector.broadcast %cst_10 : f32 to vector<16x32xf32>
      %c0_11 = arith.constant 0 : index
      %c0_12 = arith.constant 0 : index
      %13 = vector.load %arg9[%c0_11, %c0_12] : memref<16x32xf32, #tpu.memory_space<vmem>>, vector<16x32xf32>
      tpu.vector_store %arg9[%c0_11, %c0_12], %12 {strides = array<i32>} : memref<16x32xf32, #tpu.memory_space<vmem>>, vector<16x32xf32>,
    } else {
    }
    %c0 = arith.constant 0 : index
    %c0_1 = arith.constant 0 : index
    %3 = vector.load %arg9[%c0, %c0_1] : memref<16x32xf32, #tpu.memory_space<vmem>>, vector<16x32xf32>
    %c0_2 = arith.constant 0 : index
    %c0_3 = arith.constant 0 : index
    %4 = vector.load %arg2[%c0_2, %c0_3] : memref<16x32xbf16, #tpu.memory_space<vmem>>, vector<16x32xbf16>
    %c0_4 = arith.constant 0 : index
    %c0_5 = arith.constant 0 : index
    %5 = vector.load %arg3[%c0_4, %c0_5] : memref<32x32xbf16, #tpu.memory_space<vmem>>, vector<32x32xbf16>
    %cst = arith.constant dense<0.000000e+00> : vector<16x32xf32>
    %6 = tpu.matmul %4, %5, %cst {dimension_numbers = #tpu.dot_dimension_numbers<[1], [0], [0], [1], [0, 0, 1, 1], [], []>} : vector<16x32xbf16>, vector<32x32xbf16>, vector<16x32xf32> -> vector<16x32xf32>
    %7 = arith.addf %3, %6 : vector<16x32xf32>
    %c0_6 = arith.constant 0 : index
    %c0_7 = arith.constant 0 : index
    %8 = vector.load %arg9[%c0_6, %c0_7] : memref<16x32xf32, #tpu.memory_space<vmem>>, vector<16x32xf32>
    tpu.vector_store %arg9[%c0_6, %c0_7], %7 {strides = array<i32>} : memref<16x32xf32, #tpu.memory_space<vmem>>, vector<16x32xf32>,
    %c0_i32_8 = arith.constant 0 : i32
    %9 = arith.cmpi eq, %arg1, %c0_i32_8 : i32
    %10 = arith.extui %9 : i1 to i32
    %c0_i32_9 = arith.constant 0 : i32
    %11 = arith.cmpi ne, %10, %c0_i32_9 : i32
    scf.if %11 {
      %c0_10 = arith.constant 0 : index
      %c0_11 = arith.constant 0 : index
      %12 = vector.load %arg9[%c0_10, %c0_11] : memref<16x32xf32, #tpu.memory_space<vmem>>, vector<16x32xf32>
      %c0_12 = arith.constant 0 : index
      %c0_13 = arith.constant 0 : index
      %13 = vector.load %arg4[%c0_12, %c0_13] : memref<1x32xf32, #tpu.memory_space<vmem>>, vector<1x32xf32>
      %14 = vector.broadcast %13 : vector<1x32xf32> to vector<16x32xf32>
      %15 = arith.addf %12, %14 : vector<16x32xf32>
      %c0_14 = arith.constant 0 : index
      %c0_15 = arith.constant 0 : index
      %16 = vector.load %arg5[%c0_14, %c0_15] : memref<16x32xf32, #tpu.memory_space<vmem>>, vector<16x32xf32>
      %17 = arith.addf %15, %16 : vector<16x32xf32>
      %cst_16 = arith.constant dense<0.000000e+00> : vector<16xf32>
      %18 = vector.multi_reduction <add>, %17, %cst_16 [1] : vector<16x32xf32> to vector<16xf32>
      %19 = vector.shape_cast %18 : vector<16xf32> to vector<16x1xf32>
      %cst_17 = arith.constant 3.200000e+01 : f32
      %20 = vector.broadcast %cst_17 : f32 to vector<16x1xf32>
      %21 = arith.divf %19, %20 : vector<16x1xf32>
      %22 = vector.broadcast %21 : vector<16x1xf32> to vector<16x32xf32>
      %23 = arith.subf %17, %22 : vector<16x32xf32>
      %24 = arith.mulf %23, %23 : vector<16x32xf32>
      %cst_18 = arith.constant dense<0.000000e+00> : vector<16xf32>
      %25 = vector.multi_reduction <add>, %24, %cst_18 [1] : vector<16x32xf32> to vector<16xf32>
      %26 = vector.shape_cast %25 : vector<16xf32> to vector<16x1xf32>
      %cst_19 = arith.constant 3.200000e+01 : f32
      %27 = vector.broadcast %cst_19 : f32 to vector<16x1xf32>
      %28 = arith.divf %26, %27 : vector<16x1xf32>
      %29 = vector.broadcast %21 : vector<16x1xf32> to vector<16x32xf32>
      %30 = arith.subf %17, %29 : vector<16x32xf32>
      %cst_20 = arith.constant 9.99999996E-13 : f32
      %31 = vector.broadcast %cst_20 : f32 to vector<16x1xf32>
      %32 = arith.addf %28, %31 : vector<16x1xf32>
      %33 = math.rsqrt %32 : vector<16x1xf32>
      %34 = vector.broadcast %33 : vector<16x1xf32> to vector<16x32xf32>
      %35 = arith.mulf %30, %34 : vector<16x32xf32>
      %c0_21 = arith.constant 0 : index
      %c0_22 = arith.constant 0 : index
      %36 = vector.load %arg6[%c0_21, %c0_22] : memref<1x32xf32, #tpu.memory_space<vmem>>, vector<1x32xf32>
      %37 = vector.broadcast %36 : vector<1x32xf32> to vector<16x32xf32>
      %38 = arith.mulf %35, %37 : vector<16x32xf32>
      %c0_23 = arith.constant 0 : index
      %c0_24 = arith.constant 0 : index
      %39 = vector.load %arg7[%c0_23, %c0_24] : memref<1x32xf32, #tpu.memory_space<vmem>>, vector<1x32xf32>
      %40 = vector.broadcast %39 : vector<1x32xf32> to vector<16x32xf32>
      %41 = arith.addf %38, %40 : vector<16x32xf32>
      %c0_25 = arith.constant 0 : index
      %c0_26 = arith.constant 0 : index
      %42 = vector.load %arg8[%c0_25, %c0_26] : memref<16x32xf32, #tpu.memory_space<vmem>>, vector<16x32xf32>
      tpu.vector_store %arg8[%c0_25, %c0_26], %41 {strides = array<i32>} : memref<16x32xf32, #tpu.memory_space<vmem>>, vector<16x32xf32>,
    } else {
    }
    return
  }
  func.func @transform_0(%arg0: i32, %arg1: i32) -> (i32, i32) {
    %c0_i32 = arith.constant 0 : i32
    return %arg0, %arg1 : i32, i32
  }
  func.func @transform_1(%arg0: i32, %arg1: i32) -> (i32, i32) {
    %c0_i32 = arith.constant 0 : i32
    %c0_i32_0 = arith.constant 0 : i32
    return %arg1, %c0_i32 : i32, i32
  }
  func.func @transform_2(%arg0: i32, %arg1: i32) -> (i32, i32) {
    %c0_i32 = arith.constant 0 : i32
    %c0_i32_0 = arith.constant 0 : i32
    %c0_i32_1 = arith.constant 0 : i32
    return %c0_i32, %c0_i32_0 : i32, i32
  }
  func.func @transform_3(%arg0: i32, %arg1: i32) -> (i32, i32) {
    %c0_i32 = arith.constant 0 : i32
    %c0_i32_0 = arith.constant 0 : i32
    return %arg0, %c0_i32 : i32, i32
  }
  func.func @transform_4(%arg0: i32, %arg1: i32) -> (i32, i32) {
    %c0_i32 = arith.constant 0 : i32
    %c0_i32_0 = arith.constant 0 : i32
    %c0_i32_1 = arith.constant 0 : i32
    return %c0_i32, %c0_i32_0 : i32, i32
  }
  func.func @transform_5(%arg0: i32, %arg1: i32) -> (i32, i32) {
    %c0_i32 = arith.constant 0 : i32
    %c0_i32_0 = arith.constant 0 : i32
    %c0_i32_1 = arith.constant 0 : i32
    return %c0_i32, %c0_i32_0 : i32, i32
  }
  func.func @transform_6(%arg0: i32, %arg1: i32) -> (i32, i32) {
    %c0_i32 = arith.constant 0 : i32
    %c0_i32_0 = arith.constant 0 : i32
    return %arg0, %c0_i32 : i32, i32
  }
}

module attributes {stable_mosaic.version = 11 : i64} {
  func.func @_attention_kernel(%arg0: i32, %arg1: memref<1x8x96xbf16, #tpu.memory_space<vmem>>, %arg2: memref<1x8x32xbf16, #tpu.memory_space<vmem>>) attributes {dimension_semantics = [#tpu.dimension_semantics<parallel>], iteration_bounds = array<i64: 2>, scalar_prefetch = 0 : i64, scratch_operands = 0 : i64, tpu.core_type = #tpu.core_type<tc>, window_params = [{transform_indices = @transform_0, window_bounds = array<i64: 1, 8, 96>}, {transform_indices = @transform_1, window_bounds = array<i64: 1, 8, 32>}]} {
    %c0 = arith.constant 0 : index
    %c0_0 = arith.constant 0 : index
    %c0_1 = arith.constant 0 : index
    %0 = vector.load %arg1[%c0, %c0_0, %c0_1] : memref<1x8x96xbf16, #tpu.memory_space<vmem>>, vector<1x8x16xbf16>
    %1 = vector.shape_cast %0 : vector<1x8x16xbf16> to vector<8x16xbf16>
    %c0_2 = arith.constant 0 : index
    %c0_3 = arith.constant 0 : index
    %c32 = arith.constant 32 : index
    %2 = vector.load %arg1[%c0_2, %c0_3, %c32] : memref<1x8x96xbf16, #tpu.memory_space<vmem>>, vector<1x8x16xbf16>
    %3 = vector.shape_cast %2 : vector<1x8x16xbf16> to vector<8x16xbf16>
    %c0_4 = arith.constant 0 : index
    %c0_5 = arith.constant 0 : index
    %c64 = arith.constant 64 : index
    %4 = vector.load %arg1[%c0_4, %c0_5, %c64] : memref<1x8x96xbf16, #tpu.memory_space<vmem>>, vector<1x8x16xbf16>
    %5 = vector.shape_cast %4 : vector<1x8x16xbf16> to vector<8x16xbf16>
    %cst = arith.constant dense<0.000000e+00> : vector<8x8xf32>
    %6 = tpu.matmul %1, %3, %cst {dimension_numbers = #tpu.dot_dimension_numbers<[1], [1], [0], [0], [0, 0, 1, 0], [], []>} : vector<8x16xbf16>, vector<8x16xbf16>, vector<8x8xf32> -> vector<8x8xf32>
    %cst_6 = arith.constant 2.500000e-01 : f32
    %7 = vector.broadcast %cst_6 : f32 to vector<8x8xf32>
    %8 = arith.mulf %6, %7 : vector<8x8xf32>
    %cst_7 = arith.constant dense<0xFF800000> : vector<8xf32>
    %9 = vector.multi_reduction <maximumf>, %8, %cst_7 [1] : vector<8x8xf32> to vector<8xf32>
    %10 = vector.shape_cast %9 : vector<8xf32> to vector<8x1xf32>
    %11 = vector.broadcast %10 : vector<8x1xf32> to vector<8x8xf32>
    %12 = arith.subf %8, %11 : vector<8x8xf32>
    %13 = math.exp %12 : vector<8x8xf32>
    %cst_8 = arith.constant dense<0.000000e+00> : vector<8xf32>
    %14 = vector.multi_reduction <add>, %13, %cst_8 [1] : vector<8x8xf32> to vector<8xf32>
    %15 = vector.shape_cast %14 : vector<8xf32> to vector<8x1xf32>
    %16 = tpu.reciprocal %15 {approx = true} : vector<8x1xf32> -> vector<8x1xf32>
    %17 = vector.broadcast %16 : vector<8x1xf32> to vector<8x8xf32>
    %18 = arith.mulf %13, %17 : vector<8x8xf32>
    %19 = arith.truncf %18 : vector<8x8xf32> to vector<8x8xbf16>
    %cst_9 = arith.constant dense<0.000000e+00> : vector<8x16xf32>
    %20 = tpu.matmul %19, %5, %cst_9 {dimension_numbers = #tpu.dot_dimension_numbers<[1], [0], [0], [1], [0, 0, 1, 1], [], []>} : vector<8x8xbf16>, vector<8x16xbf16>, vector<8x16xf32> -> vector<8x16xf32>
    %c0_10 = arith.constant 0 : index
    %c0_11 = arith.constant 0 : index
    %c16 = arith.constant 16 : index
    %21 = vector.load %arg1[%c0_10, %c0_11, %c16] : memref<1x8x96xbf16, #tpu.memory_space<vmem>>, vector<1x8x16xbf16>
    %22 = vector.shape_cast %21 : vector<1x8x16xbf16> to vector<8x16xbf16>
    %c0_12 = arith.constant 0 : index
    %c0_13 = arith.constant 0 : index
    %c48 = arith.constant 48 : index
    %23 = vector.load %arg1[%c0_12, %c0_13, %c48] : memref<1x8x96xbf16, #tpu.memory_space<vmem>>, vector<1x8x16xbf16>
    %24 = vector.shape_cast %23 : vector<1x8x16xbf16> to vector<8x16xbf16>
    %c0_14 = arith.constant 0 : index
    %c0_15 = arith.constant 0 : index
    %c80 = arith.constant 80 : index
    %25 = vector.load %arg1[%c0_14, %c0_15, %c80] : memref<1x8x96xbf16, #tpu.memory_space<vmem>>, vector<1x8x16xbf16>
    %26 = vector.shape_cast %25 : vector<1x8x16xbf16> to vector<8x16xbf16>
    %cst_16 = arith.constant dense<0.000000e+00> : vector<8x8xf32>
    %27 = tpu.matmul %22, %24, %cst_16 {dimension_numbers = #tpu.dot_dimension_numbers<[1], [1], [0], [0], [0, 0, 1, 0], [], []>} : vector<8x16xbf16>, vector<8x16xbf16>, vector<8x8xf32> -> vector<8x8xf32>
    %cst_17 = arith.constant 2.500000e-01 : f32
    %28 = vector.broadcast %cst_17 : f32 to vector<8x8xf32>
    %29 = arith.mulf %27, %28 : vector<8x8xf32>
    %cst_18 = arith.constant dense<0xFF800000> : vector<8xf32>
    %30 = vector.multi_reduction <maximumf>, %29, %cst_18 [1] : vector<8x8xf32> to vector<8xf32>
    %31 = vector.shape_cast %30 : vector<8xf32> to vector<8x1xf32>
    %32 = vector.broadcast %31 : vector<8x1xf32> to vector<8x8xf32>
    %33 = arith.subf %29, %32 : vector<8x8xf32>
    %34 = math.exp %33 : vector<8x8xf32>
    %cst_19 = arith.constant dense<0.000000e+00> : vector<8xf32>
    %35 = vector.multi_reduction <add>, %34, %cst_19 [1] : vector<8x8xf32> to vector<8xf32>
    %36 = vector.shape_cast %35 : vector<8xf32> to vector<8x1xf32>
    %37 = tpu.reciprocal %36 {approx = true} : vector<8x1xf32> -> vector<8x1xf32>
    %38 = vector.broadcast %37 : vector<8x1xf32> to vector<8x8xf32>
    %39 = arith.mulf %34, %38 : vector<8x8xf32>
    %40 = arith.truncf %39 : vector<8x8xf32> to vector<8x8xbf16>
    %cst_20 = arith.constant dense<0.000000e+00> : vector<8x16xf32>
    %41 = tpu.matmul %40, %26, %cst_20 {dimension_numbers = #tpu.dot_dimension_numbers<[1], [0], [0], [1], [0, 0, 1, 1], [], []>} : vector<8x8xbf16>, vector<8x16xbf16>, vector<8x16xf32> -> vector<8x16xf32>
    %42 = tpu.concatenate %20, %41 in 1 : vector<8x16xf32>, vector<8x16xf32> -> vector<8x32xf32>
    %43 = arith.truncf %42 : vector<8x32xf32> to vector<8x32xbf16>
    %c0_21 = arith.constant 0 : index
    %c0_22 = arith.constant 0 : index
    %c0_23 = arith.constant 0 : index
    %44 = vector.load %arg2[%c0_21, %c0_22, %c0_23] : memref<1x8x32xbf16, #tpu.memory_space<vmem>>, vector<1x8x32xbf16>
    %45 = vector.shape_cast %44 : vector<1x8x32xbf16> to vector<8x32xbf16>
    %46 = vector.shape_cast %43 : vector<8x32xbf16> to vector<1x8x32xbf16>
    tpu.vector_store %arg2[%c0_21, %c0_22, %c0_23], %46 {strides = array<i32>} : memref<1x8x32xbf16, #tpu.memory_space<vmem>>, vector<1x8x32xbf16>,
    return
  }
  func.func @transform_0(%arg0: i32) -> (i32, i32, i32) {
    %c0_i32 = arith.constant 0 : i32
    %c0_i32_0 = arith.constant 0 : i32
    %c0_i32_1 = arith.constant 0 : i32
    return %arg0, %c0_i32, %c0_i32_0 : i32, i32, i32
  }
  func.func @transform_1(%arg0: i32) -> (i32, i32, i32) {
    %c0_i32 = arith.constant 0 : i32
    %c0_i32_0 = arith.constant 0 : i32
    %c0_i32_1 = arith.constant 0 : i32
    return %arg0, %c0_i32, %c0_i32_0 : i32, i32, i32
  }
}

module attributes {stable_mosaic.version = 11 : i64} {
  func.func @_matmul_bias_kernel(%arg0: i32, %arg1: i32, %arg2: i32, %arg3: memref<16x32xf32, #tpu.memory_space<vmem>>, %arg4: memref<32x64xbf16, #tpu.memory_space<vmem>>, %arg5: memref<1x64xf32, #tpu.memory_space<vmem>>, %arg6: memref<16x64xbf16, #tpu.memory_space<vmem>>, %arg7: memref<16x64xf32, #tpu.memory_space<vmem>>) attributes {dimension_semantics = [#tpu.dimension_semantics<parallel>, #tpu.dimension_semantics<parallel>, #tpu.dimension_semantics<arbitrary>], iteration_bounds = array<i64: 1, 1, 1>, scalar_prefetch = 0 : i64, scratch_operands = 1 : i64, tpu.core_type = #tpu.core_type<tc>, window_params = [{transform_indices = @transform_0, window_bounds = array<i64: 16, 32>}, {transform_indices = @transform_1, window_bounds = array<i64: 32, 64>}, {transform_indices = @transform_2, window_bounds = array<i64: 1, 64>}, {transform_indices = @transform_3, window_bounds = array<i64: 16, 64>}]} {
    %c0_i32 = arith.constant 0 : i32
    %0 = arith.cmpi eq, %arg2, %c0_i32 : i32
    %1 = arith.extui %0 : i1 to i32
    %c0_i32_0 = arith.constant 0 : i32
    %2 = arith.cmpi ne, %1, %c0_i32_0 : i32
    scf.if %2 {
      %cst_10 = arith.constant 0.000000e+00 : f32
      %13 = vector.broadcast %cst_10 : f32 to vector<16x64xf32>
      %c0_11 = arith.constant 0 : index
      %c0_12 = arith.constant 0 : index
      %14 = vector.load %arg7[%c0_11, %c0_12] : memref<16x64xf32, #tpu.memory_space<vmem>>, vector<16x64xf32>
      tpu.vector_store %arg7[%c0_11, %c0_12], %13 {strides = array<i32>} : memref<16x64xf32, #tpu.memory_space<vmem>>, vector<16x64xf32>,
    } else {
    }
    %c0 = arith.constant 0 : index
    %c0_1 = arith.constant 0 : index
    %3 = vector.load %arg7[%c0, %c0_1] : memref<16x64xf32, #tpu.memory_space<vmem>>, vector<16x64xf32>
    %c0_2 = arith.constant 0 : index
    %c0_3 = arith.constant 0 : index
    %4 = vector.load %arg3[%c0_2, %c0_3] : memref<16x32xf32, #tpu.memory_space<vmem>>, vector<16x32xf32>
    %5 = arith.truncf %4 : vector<16x32xf32> to vector<16x32xbf16>
    %c0_4 = arith.constant 0 : index
    %c0_5 = arith.constant 0 : index
    %6 = vector.load %arg4[%c0_4, %c0_5] : memref<32x64xbf16, #tpu.memory_space<vmem>>, vector<32x64xbf16>
    %cst = arith.constant dense<0.000000e+00> : vector<16x64xf32>
    %7 = tpu.matmul %5, %6, %cst {dimension_numbers = #tpu.dot_dimension_numbers<[1], [0], [0], [1], [0, 0, 1, 1], [], []>} : vector<16x32xbf16>, vector<32x64xbf16>, vector<16x64xf32> -> vector<16x64xf32>
    %8 = arith.addf %3, %7 : vector<16x64xf32>
    %c0_6 = arith.constant 0 : index
    %c0_7 = arith.constant 0 : index
    %9 = vector.load %arg7[%c0_6, %c0_7] : memref<16x64xf32, #tpu.memory_space<vmem>>, vector<16x64xf32>
    tpu.vector_store %arg7[%c0_6, %c0_7], %8 {strides = array<i32>} : memref<16x64xf32, #tpu.memory_space<vmem>>, vector<16x64xf32>,
    %c0_i32_8 = arith.constant 0 : i32
    %10 = arith.cmpi eq, %arg2, %c0_i32_8 : i32
    %11 = arith.extui %10 : i1 to i32
    %c0_i32_9 = arith.constant 0 : i32
    %12 = arith.cmpi ne, %11, %c0_i32_9 : i32
    scf.if %12 {
      %c0_10 = arith.constant 0 : index
      %c0_11 = arith.constant 0 : index
      %13 = vector.load %arg7[%c0_10, %c0_11] : memref<16x64xf32, #tpu.memory_space<vmem>>, vector<16x64xf32>
      %c0_12 = arith.constant 0 : index
      %c0_13 = arith.constant 0 : index
      %14 = vector.load %arg5[%c0_12, %c0_13] : memref<1x64xf32, #tpu.memory_space<vmem>>, vector<1x64xf32>
      %15 = vector.broadcast %14 : vector<1x64xf32> to vector<16x64xf32>
      %16 = arith.addf %13, %15 : vector<16x64xf32>
      %cst_14 = arith.constant 5.000000e-01 : f32
      %17 = vector.broadcast %cst_14 : f32 to vector<16x64xf32>
      %18 = arith.mulf %17, %16 : vector<16x64xf32>
      %cst_15 = arith.constant 0.707106769 : f32
      %19 = vector.broadcast %cst_15 : f32 to vector<16x64xf32>
      %20 = arith.mulf %16, %19 : vector<16x64xf32>
      %21 = math.erf %20 : vector<16x64xf32>
      %cst_16 = arith.constant 1.000000e+00 : f32
      %22 = vector.broadcast %cst_16 : f32 to vector<16x64xf32>
      %23 = arith.addf %22, %21 : vector<16x64xf32>
      %24 = arith.mulf %18, %23 : vector<16x64xf32>
      %25 = arith.truncf %24 : vector<16x64xf32> to vector<16x64xbf16>
      %c0_17 = arith.constant 0 : index
      %c0_18 = arith.constant 0 : index
      %26 = vector.load %arg6[%c0_17, %c0_18] : memref<16x64xbf16, #tpu.memory_space<vmem>>, vector<16x64xbf16>
      tpu.vector_store %arg6[%c0_17, %c0_18], %25 {strides = array<i32>} : memref<16x64xbf16, #tpu.memory_space<vmem>>, vector<16x64xbf16>,
    } else {
    }
    return
  }
  func.func @transform_0(%arg0: i32, %arg1: i32, %arg2: i32) -> (i32, i32) {
    %c0_i32 = arith.constant 0 : i32
    return %arg0, %arg2 : i32, i32
  }
  func.func @transform_1(%arg0: i32, %arg1: i32, %arg2: i32) -> (i32, i32) {
    %c0_i32 = arith.constant 0 : i32
    return %arg2, %arg1 : i32, i32
  }
  func.func @transform_2(%arg0: i32, %arg1: i32, %arg2: i32) -> (i32, i32) {
    %c0_i32 = arith.constant 0 : i32
    %c0_i32_0 = arith.constant 0 : i32
    return %c0_i32, %arg1 : i32, i32
  }
  func.func @transform_3(%arg0: i32, %arg1: i32, %arg2: i32) -> (i32, i32) {
    %c0_i32 = arith.constant 0 : i32
    return %arg0, %arg1 : i32, i32
  }
}

module attributes {stable_mosaic.version = 11 : i64} {
  func.func @_pool_fc_kernel(%arg0: i32, %arg1: memref<2x8x32xf32, #tpu.memory_space<vmem>>, %arg2: memref<32x4xbf16, #tpu.memory_space<vmem>>, %arg3: memref<1x4xf32, #tpu.memory_space<vmem>>, %arg4: memref<2x4xf32, #tpu.memory_space<vmem>>) attributes {dimension_semantics = [#tpu.dimension_semantics<parallel>], iteration_bounds = array<i64: 1>, scalar_prefetch = 0 : i64, scratch_operands = 0 : i64, tpu.core_type = #tpu.core_type<tc>, window_params = [{transform_indices = @transform_0, window_bounds = array<i64: 2, 8, 32>}, {pipeline_mode = #tpu.pipeline_mode<synchronous>, transform_indices = @transform_1, window_bounds = array<i64: 32, 4>}, {pipeline_mode = #tpu.pipeline_mode<synchronous>, transform_indices = @transform_2, window_bounds = array<i64: 1, 4>}, {transform_indices = @transform_3, window_bounds = array<i64: 2, 4>}]} {
    %c0 = arith.constant 0 : index
    %c0_0 = arith.constant 0 : index
    %c0_1 = arith.constant 0 : index
    %0 = vector.load %arg1[%c0, %c0_0, %c0_1] : memref<2x8x32xf32, #tpu.memory_space<vmem>>, vector<2x8x32xf32>
    %cst = arith.constant dense<0.000000e+00> : vector<2x32xf32>
    %1 = vector.multi_reduction <add>, %0, %cst [1] : vector<2x8x32xf32> to vector<2x32xf32>
    %cst_2 = arith.constant 8.000000e+00 : f32
    %2 = vector.broadcast %cst_2 : f32 to vector<2x32xf32>
    %3 = arith.divf %1, %2 : vector<2x32xf32>
    %4 = arith.truncf %3 : vector<2x32xf32> to vector<2x32xbf16>
    %c0_3 = arith.constant 0 : index
    %c0_4 = arith.constant 0 : index
    %5 = vector.load %arg2[%c0_3, %c0_4] : memref<32x4xbf16, #tpu.memory_space<vmem>>, vector<32x4xbf16>
    %cst_5 = arith.constant dense<0.000000e+00> : vector<2x4xf32>
    %6 = tpu.matmul %4, %5, %cst_5 {dimension_numbers = #tpu.dot_dimension_numbers<[1], [0], [0], [1], [0, 0, 1, 1], [], []>} : vector<2x32xbf16>, vector<32x4xbf16>, vector<2x4xf32> -> vector<2x4xf32>
    %c0_6 = arith.constant 0 : index
    %c0_7 = arith.constant 0 : index
    %7 = vector.load %arg3[%c0_6, %c0_7] : memref<1x4xf32, #tpu.memory_space<vmem>>, vector<1x4xf32>
    %8 = vector.broadcast %7 : vector<1x4xf32> to vector<2x4xf32>
    %9 = arith.addf %6, %8 : vector<2x4xf32>
    %c0_8 = arith.constant 0 : index
    %c0_9 = arith.constant 0 : index
    %10 = vector.load %arg4[%c0_8, %c0_9] : memref<2x4xf32, #tpu.memory_space<vmem>>, vector<2x4xf32>
    tpu.vector_store %arg4[%c0_8, %c0_9], %9 {strides = array<i32>} : memref<2x4xf32, #tpu.memory_space<vmem>>, vector<2x4xf32>,
    return
  }
  func.func @transform_0(%arg0: i32) -> (i32, i32, i32) {
    %c0_i32 = arith.constant 0 : i32
    %c0_i32_0 = arith.constant 0 : i32
    %c0_i32_1 = arith.constant 0 : i32
    return %arg0, %c0_i32, %c0_i32_0 : i32, i32, i32
  }
  func.func @transform_1(%arg0: i32) -> (i32, i32) {
    %c0_i32 = arith.constant 0 : i32
    %c0_i32_0 = arith.constant 0 : i32
    %c0_i32_1 = arith.constant 0 : i32
    return %c0_i32, %c0_i32_0 : i32, i32
  }
  func.func @transform_2(%arg0: i32) -> (i32, i32) {
    %c0_i32 = arith.constant 0 : i32
    %c0_i32_0 = arith.constant 0 : i32
    %c0_i32_1 = arith.constant 0 : i32
    return %c0_i32, %c0_i32_0 : i32, i32
  }
  func.func @transform_3(%arg0: i32) -> (i32, i32) {
    %c0_i32 = arith.constant 0 : i32
    %c0_i32_0 = arith.constant 0 : i32
    return %arg0, %c0_i32 : i32, i32
  }
}

module attributes {stable_mosaic.version = 11 : i64} {
  func.func @_matmul_add_ln_kernel(%arg0: i32, %arg1: i32, %arg2: memref<16x64xbf16, #tpu.memory_space<vmem>>, %arg3: memref<64x32xbf16, #tpu.memory_space<vmem>>, %arg4: memref<1x32xf32, #tpu.memory_space<vmem>>, %arg5: memref<16x32xf32, #tpu.memory_space<vmem>>, %arg6: memref<1x32xf32, #tpu.memory_space<vmem>>, %arg7: memref<1x32xf32, #tpu.memory_space<vmem>>, %arg8: memref<16x32xf32, #tpu.memory_space<vmem>>, %arg9: memref<16x32xf32, #tpu.memory_space<vmem>>) attributes {dimension_semantics = [#tpu.dimension_semantics<parallel>, #tpu.dimension_semantics<arbitrary>], iteration_bounds = array<i64: 1, 1>, scalar_prefetch = 0 : i64, scratch_operands = 1 : i64, tpu.core_type = #tpu.core_type<tc>, window_params = [{transform_indices = @transform_0, window_bounds = array<i64: 16, 64>}, {transform_indices = @transform_1, window_bounds = array<i64: 64, 32>}, {pipeline_mode = #tpu.pipeline_mode<synchronous>, transform_indices = @transform_2, window_bounds = array<i64: 1, 32>}, {transform_indices = @transform_3, window_bounds = array<i64: 16, 32>}, {pipeline_mode = #tpu.pipeline_mode<synchronous>, transform_indices = @transform_4, window_bounds = array<i64: 1, 32>}, {pipeline_mode = #tpu.pipeline_mode<synchronous>, transform_indices = @transform_5, window_bounds = array<i64: 1, 32>}, {transform_indices = @transform_6, window_bounds = array<i64: 16, 32>}]} {
    %c0_i32 = arith.constant 0 : i32
    %0 = arith.cmpi eq, %arg1, %c0_i32 : i32
    %1 = arith.extui %0 : i1 to i32
    %c0_i32_0 = arith.constant 0 : i32
    %2 = arith.cmpi ne, %1, %c0_i32_0 : i32
    scf.if %2 {
      %cst_10 = arith.constant 0.000000e+00 : f32
      %12 = vector.broadcast %cst_10 : f32 to vector<16x32xf32>
      %c0_11 = arith.constant 0 : index
      %c0_12 = arith.constant 0 : index
      %13 = vector.load %arg9[%c0_11, %c0_12] : memref<16x32xf32, #tpu.memory_space<vmem>>, vector<16x32xf32>
      tpu.vector_store %arg9[%c0_11, %c0_12], %12 {strides = array<i32>} : memref<16x32xf32, #tpu.memory_space<vmem>>, vector<16x32xf32>,
    } else {
    }
    %c0 = arith.constant 0 : index
    %c0_1 = arith.constant 0 : index
    %3 = vector.load %arg9[%c0, %c0_1] : memref<16x32xf32, #tpu.memory_space<vmem>>, vector<16x32xf32>
    %c0_2 = arith.constant 0 : index
    %c0_3 = arith.constant 0 : index
    %4 = vector.load %arg2[%c0_2, %c0_3] : memref<16x64xbf16, #tpu.memory_space<vmem>>, vector<16x64xbf16>
    %c0_4 = arith.constant 0 : index
    %c0_5 = arith.constant 0 : index
    %5 = vector.load %arg3[%c0_4, %c0_5] : memref<64x32xbf16, #tpu.memory_space<vmem>>, vector<64x32xbf16>
    %cst = arith.constant dense<0.000000e+00> : vector<16x32xf32>
    %6 = tpu.matmul %4, %5, %cst {dimension_numbers = #tpu.dot_dimension_numbers<[1], [0], [0], [1], [0, 0, 1, 1], [], []>} : vector<16x64xbf16>, vector<64x32xbf16>, vector<16x32xf32> -> vector<16x32xf32>
    %7 = arith.addf %3, %6 : vector<16x32xf32>
    %c0_6 = arith.constant 0 : index
    %c0_7 = arith.constant 0 : index
    %8 = vector.load %arg9[%c0_6, %c0_7] : memref<16x32xf32, #tpu.memory_space<vmem>>, vector<16x32xf32>
    tpu.vector_store %arg9[%c0_6, %c0_7], %7 {strides = array<i32>} : memref<16x32xf32, #tpu.memory_space<vmem>>, vector<16x32xf32>,
    %c0_i32_8 = arith.constant 0 : i32
    %9 = arith.cmpi eq, %arg1, %c0_i32_8 : i32
    %10 = arith.extui %9 : i1 to i32
    %c0_i32_9 = arith.constant 0 : i32
    %11 = arith.cmpi ne, %10, %c0_i32_9 : i32
    scf.if %11 {
      %c0_10 = arith.constant 0 : index
      %c0_11 = arith.constant 0 : index
      %12 = vector.load %arg9[%c0_10, %c0_11] : memref<16x32xf32, #tpu.memory_space<vmem>>, vector<16x32xf32>
      %c0_12 = arith.constant 0 : index
      %c0_13 = arith.constant 0 : index
      %13 = vector.load %arg4[%c0_12, %c0_13] : memref<1x32xf32, #tpu.memory_space<vmem>>, vector<1x32xf32>
      %14 = vector.broadcast %13 : vector<1x32xf32> to vector<16x32xf32>
      %15 = arith.addf %12, %14 : vector<16x32xf32>
      %c0_14 = arith.constant 0 : index
      %c0_15 = arith.constant 0 : index
      %16 = vector.load %arg5[%c0_14, %c0_15] : memref<16x32xf32, #tpu.memory_space<vmem>>, vector<16x32xf32>
      %17 = arith.addf %15, %16 : vector<16x32xf32>
      %cst_16 = arith.constant dense<0.000000e+00> : vector<16xf32>
      %18 = vector.multi_reduction <add>, %17, %cst_16 [1] : vector<16x32xf32> to vector<16xf32>
      %19 = vector.shape_cast %18 : vector<16xf32> to vector<16x1xf32>
      %cst_17 = arith.constant 3.200000e+01 : f32
      %20 = vector.broadcast %cst_17 : f32 to vector<16x1xf32>
      %21 = arith.divf %19, %20 : vector<16x1xf32>
      %22 = vector.broadcast %21 : vector<16x1xf32> to vector<16x32xf32>
      %23 = arith.subf %17, %22 : vector<16x32xf32>
      %24 = arith.mulf %23, %23 : vector<16x32xf32>
      %cst_18 = arith.constant dense<0.000000e+00> : vector<16xf32>
      %25 = vector.multi_reduction <add>, %24, %cst_18 [1] : vector<16x32xf32> to vector<16xf32>
      %26 = vector.shape_cast %25 : vector<16xf32> to vector<16x1xf32>
      %cst_19 = arith.constant 3.200000e+01 : f32
      %27 = vector.broadcast %cst_19 : f32 to vector<16x1xf32>
      %28 = arith.divf %26, %27 : vector<16x1xf32>
      %29 = vector.broadcast %21 : vector<16x1xf32> to vector<16x32xf32>
      %30 = arith.subf %17, %29 : vector<16x32xf32>
      %cst_20 = arith.constant 9.99999996E-13 : f32
      %31 = vector.broadcast %cst_20 : f32 to vector<16x1xf32>
      %32 = arith.addf %28, %31 : vector<16x1xf32>
      %33 = math.rsqrt %32 : vector<16x1xf32>
      %34 = vector.broadcast %33 : vector<16x1xf32> to vector<16x32xf32>
      %35 = arith.mulf %30, %34 : vector<16x32xf32>
      %c0_21 = arith.constant 0 : index
      %c0_22 = arith.constant 0 : index
      %36 = vector.load %arg6[%c0_21, %c0_22] : memref<1x32xf32, #tpu.memory_space<vmem>>, vector<1x32xf32>
      %37 = vector.broadcast %36 : vector<1x32xf32> to vector<16x32xf32>
      %38 = arith.mulf %35, %37 : vector<16x32xf32>
      %c0_23 = arith.constant 0 : index
      %c0_24 = arith.constant 0 : index
      %39 = vector.load %arg7[%c0_23, %c0_24] : memref<1x32xf32, #tpu.memory_space<vmem>>, vector<1x32xf32>
      %40 = vector.broadcast %39 : vector<1x32xf32> to vector<16x32xf32>
      %41 = arith.addf %38, %40 : vector<16x32xf32>
      %c0_25 = arith.constant 0 : index
      %c0_26 = arith.constant 0 : index
      %42 = vector.load %arg8[%c0_25, %c0_26] : memref<16x32xf32, #tpu.memory_space<vmem>>, vector<16x32xf32>
      tpu.vector_store %arg8[%c0_25, %c0_26], %41 {strides = array<i32>} : memref<16x32xf32, #tpu.memory_space<vmem>>, vector<16x32xf32>,
    } else {
    }
    return
  }
  func.func @transform_0(%arg0: i32, %arg1: i32) -> (i32, i32) {
    %c0_i32 = arith.constant 0 : i32
    return %arg0, %arg1 : i32, i32
  }
  func.func @transform_1(%arg0: i32, %arg1: i32) -> (i32, i32) {
    %c0_i32 = arith.constant 0 : i32
    %c0_i32_0 = arith.constant 0 : i32
    return %arg1, %c0_i32 : i32, i32
  }
  func.func @transform_2(%arg0: i32, %arg1: i32) -> (i32, i32) {
    %c0_i32 = arith.constant 0 : i32
    %c0_i32_0 = arith.constant 0 : i32
    %c0_i32_1 = arith.constant 0 : i32
    return %c0_i32, %c0_i32_0 : i32, i32
  }
  func.func @transform_3(%arg0: i32, %arg1: i32) -> (i32, i32) {
    %c0_i32 = arith.constant 0 : i32
    %c0_i32_0 = arith.constant 0 : i32
    return %arg0, %c0_i32 : i32, i32
  }
  func.func @transform_4(%arg0: i32, %arg1: i32) -> (i32, i32) {
    %c0_i32 = arith.constant 0 : i32
    %c0_i32_0 = arith.constant 0 : i32
    %c0_i32_1 = arith.constant 0 : i32
    return %c0_i32, %c0_i32_0 : i32, i32
  }
  func.func @transform_5(%arg0: i32, %arg1: i32) -> (i32, i32) {
    %c0_i32 = arith.constant 0 : i32
    %c0_i32_0 = arith.constant 0 : i32
    %c0_i32_1 = arith.constant 0 : i32
    return %c0_i32, %c0_i32_0 : i32, i32
  }
  func.func @transform_6(%arg0: i32, %arg1: i32) -> (i32, i32) {
    %c0_i32 = arith.constant 0 : i32
    %c0_i32_0 = arith.constant 0 : i32
    return %arg0, %c0_i32 : i32, i32
  }
}

</mosaic_0001>

<bundles_post_ra>
// kernel: _lambda_.10
= control target key start
LH: loop header
LB: loop body
LE: loop exit
PB: predicated region body
PF: predicated region fallthrough
CT: control target
= control target key end

     0   :  { %11 = vsyncpa [#allocation4], 0  ;;  %s235_s24 = smov [#allocation3]   ;;  %s236_s26 = smov 64   ;;  %s313_s0 = inlined_call_operand.vmem [shape: bf16[16,32], index: 0, kind: input, shape index: {}]   ;;  %s314_s1 = inlined_call_operand.hbm [shape: bf16[32,32], index: 1, kind: input, shape index: {}]   ;;  %s315_s2 = inlined_call_operand.vmem [shape: f32[1,32], index: 2, kind: input, shape index: {}, may-alias: {2,5}]   ;;  %s316_s3 = inlined_call_operand.vmem [shape: f32[16,32], index: 3, kind: input, shape index: {}]   ;;  %s317_s4 = inlined_call_operand.vmem [shape: f32[1,32], index: 4, kind: input, shape index: {}]   ;;  %s318_s5 = inlined_call_operand.vmem [shape: f32[1,32], index: 5, kind: input, shape index: {}, may-alias: {2,5}]   ;;  %s319_s6 = inlined_call_operand.vmem [shape: f32[16,32], index: 6, kind: output, shape index: {}]  }
   0x1   :  { %s18_s23 = sshll.u32 %s314_s1, 4  ;;  %s20_s25 = sshll.u32 %s235_s24, 4  ;;  %s19_s23 = int_to_ptr.hbm [resolvable:$true] %s18_s23  ;;  %s21_s25 = int_to_ptr.vmem [resolvable:$true] %s20_s25 }
   0x2   :  { %s237_s27 = smov 4  }
   0x3   :  { %26 = dma.hbm_to_vmem [thread:$0]  %s19_s23, 256, %s21_s25, [#allocation4], %s236_s26, %s236_s26, %s237_s27  }
   0x4   :  { %233 = dma.done.wait [#allocation4], 256  }
   0x5   :  { %234 = vsyncadd [#allocation4], 4294967040  ;;  %vm44_vm0 = vcmask 261120   ;;  %v238_v0 = vmov 0.0   ;;  %v194_v1 = vld [vmem:[#allocation3 + $0x8] sm:$0xff]  ;;  %v193_v2 = vld [vmem:[#allocation3] sm:$0xff] }
   0x6   :  { %45 = vst.msk [vmem:[#allocation2] sm:$0xff] %vm44_vm0, %v238_v0  ;;  %82 = vmatpush.bf16.msra.mxu0 %v194_v1  ;;  %v192_v3 = vld [vmem:[%s313_s0] sm:$0xff]  ;;  %v106_v17 = vld [vmem:[%s316_s3 + $0x8] sm:$0xff]  ;;  %v239_v21 = vmov 32.0  }
   0x7   :  { %46 = vst.msk [vmem:[#allocation2 + $0x8] sm:$0xff] %vm44_vm0, %v238_v0  ;;  %v200_v8 = vld [vmem:[%s315_s2] ss:$0 sm:$0xff]  ;;  %203 = vrcp.f32 %v239_v21 }
   0x8   :  { %v105_v12 = vld [vmem:[%s316_s3] sm:$0xff] }
   0x9   :  { %v201_v52 = vld [vmem:[%s317_s4] ss:$0 sm:$0xff] }
   0xa   :  { %83 = vmatpush.bf16.msra.mxu0 %v193_v2  ;;  %v202_v55 = vld [vmem:[%s318_s5] ss:$0 sm:$0xff] }
   0xd   :  { %191 = vmatmul.msk.bf16.vlgmr.msra.gmra.mxu0 %vm44_vm0, %v192_v3  ;;  %v47_v4 = vld [vmem:[#allocation2] sm:$0xff]  ;;  %v204_v22 = vpop.eup %203 }
   0xe   :  { %v48_v7 = vld [vmem:[#allocation2 + $0x8] sm:$0xff]  ;;  %v116_v23 = vmul.f32 32.0, %v204_v22  ;;  %vm120_vm1 = vweird.f32 %v204_v22 }
  0x10   :  { %v117_v24 = vsub.f32 1.0, %v116_v23 }
  0x12   :  { %v118_v25 = vmul.f32 %v204_v22, %v117_v24 }
  0x14   :  { %v119_v26 = vadd.f32 %v204_v22, %v118_v25 }
  0x16   :  { %v121_v27 = vsel %vm120_vm1, %v204_v22, %v119_v26 }
  0x8a   :  { %v85_v5 = vpop.f32.mrf.mxu0 }
  0x8b   :  { %v90_v6 = vadd.f32 %v85_v5, %v47_v4 }
  0x8d   :  { %92 = vst.msk [vmem:[#allocation2] sm:$0xff] %vm44_vm0, %v90_v6 }
  0x92   :  { %v87_v9 = vpop.f32.mrf.mxu0 }
  0x93   :  { %v91_v10 = vadd.f32 %v87_v9, %v48_v7 }
  0x94   :  { %v97_v11 = vld [vmem:[#allocation2] sm:$0xff] }
  0x95   :  { %93 = vst.msk [vmem:[#allocation2 + $0x8] sm:$0xff] %vm44_vm0, %v91_v10  ;;  %v103_v13 = vadd.f32 %v200_v8, %v97_v11 }
  0x97   :  { %v107_v14 = vadd.f32 %v105_v12, %v103_v13 }
  0x99   :  { %v109_v15 = vsel %vm44_vm0, %v107_v14, 0.0 }
  0x9a   :  { %110 = vadd.xlane.f32.xlu0 %v109_v15 }
  0x9c   :  { %v98_v16 = vld [vmem:[#allocation2 + $0x8] sm:$0xff] }
  0x9d   :  { %v104_v18 = vadd.f32 %v200_v8, %v98_v16 }
  0x9f   :  { %v108_v19 = vadd.f32 %v106_v17, %v104_v18 }
  0xa1   :  { %v112_v20 = vsel %vm44_vm0, %v108_v19, 0.0 }
  0xa2   :  { %113 = vadd.xlane.f32.xlu0 %v112_v20 }
 0x10d   :  { %v111_v28 = vpop.xlane.xlu0 %110 }
 0x10e   :  { %v122_v29 = vmul.f32 %v121_v27, %v111_v28 }
 0x110   :  { %v124_v30 = vsub.f32 %v107_v14, %v122_v29 }
 0x112   :  { %v126_v31 = vmul.f32 %v124_v30, %v124_v30 }
 0x114   :  { %v128_v32 = vsel %vm44_vm0, %v126_v31, 0.0 }
 0x115   :  { %129 = vadd.xlane.f32.xlu1 %v128_v32  ;;  %v114_v33 = vpop.xlane.xlu0 %113 }
 0x116   :  { %v123_v34 = vmul.f32 %v121_v27, %v114_v33 }
 0x118   :  { %v125_v35 = vsub.f32 %v108_v19, %v123_v34 }
 0x11a   :  { %v127_v36 = vmul.f32 %v125_v35, %v125_v35 }
 0x11c   :  { %v131_v37 = vsel %vm44_vm0, %v127_v36, 0.0 }
 0x11d   :  { %132 = vadd.xlane.f32.xlu1 %v131_v37 }
 0x188   :  { %v130_v38 = vpop.xlane.xlu1 %129 }
 0x189   :  { %v134_v39 = vmul.f32 %v130_v38, %v121_v27 }
 0x18b   :  { %v136_v40 = vadd.f32 1e-12, %v134_v39 }
 0x18d   :  { %205 = vrsqrt.f32 %v136_v40  ;;  %vm144_vm3 = vweird.f32 %v136_v40 }
 0x190   :  { %v133_v41 = vpop.xlane.xlu1 %132 }
 0x191   :  { %v135_v42 = vmul.f32 %v133_v41, %v121_v27 }
 0x193   :  { %v206_v43 = vpop.eup %205  ;;  %v137_v44 = vadd.f32 1e-12, %v135_v42 }
 0x194   :  { %v139_v45 = vmul.f32 %v206_v43, %v136_v40  ;;  %vm145_vm2 = vweird.f32 %v206_v43 }
 0x195   :  { %207 = vrsqrt.f32 %v137_v44  ;;  %vm146_vm4 = vmor %vm144_vm3, %vm145_vm2  ;;  %vm154_vm6 = vweird.f32 %v137_v44 }
 0x196   :  { %v140_v46 = vmul.f32 %v206_v43, %v139_v45 }
 0x198   :  { %v141_v47 = vmul.f32 0.5, %v140_v46 }
 0x19a   :  { %v142_v48 = vsub.f32 1.5, %v141_v47 }
 0x19b   :  { %v208_v49 = vpop.eup %207 }
 0x19c   :  { %v143_v50 = vmul.f32 %v206_v43, %v142_v48  ;;  %v149_v51 = vmul.f32 %v208_v49, %v137_v44  ;;  %vm155_vm5 = vweird.f32 %v208_v49 }
 0x19d   :  { %vm156_vm7 = vmor %vm154_vm6, %vm155_vm5 }
 0x19e   :  { %v147_v53 = vsel %vm146_vm4, %v206_v43, %v143_v50  ;;  %v150_v54 = vmul.f32 %v208_v49, %v149_v51 }
 0x19f   :  { %v158_v56 = vmul.f32 %v147_v53, %v124_v30 }
 0x1a0   :  { %v151_v57 = vmul.f32 0.5, %v150_v54 }
 0x1a1   :  { %v164_v58 = vmul.f32 %v201_v52, %v158_v56 }
 0x1a2   :  { %v152_v59 = vsub.f32 1.5, %v151_v57 }
 0x1a3   :  { %v170_v60 = vadd.f32 %v202_v55, %v164_v58 }
 0x1a4   :  { %v153_v61 = vmul.f32 %v208_v49, %v152_v59 }
 0x1a5   :  { %172 = vst.msk [vmem:[%s319_s6] sm:$0xff] %vm44_vm0, %v170_v60 }
 0x1a6   :  { %v157_v62 = vsel %vm156_vm7, %v208_v49, %v153_v61 }
 0x1a7   :  { %v159_v63 = vmul.f32 %v157_v62, %v125_v35 }
 0x1a9   :  { %v165_v0 = vmul.f32 %v201_v52, %v159_v63 }
 0x1ab   :  { %v171_v1 = vadd.f32 %v202_v55, %v165_v0 }
 0x1ad   :  { %173 = vst.msk [vmem:[%s319_s6 + $0x8] sm:$0xff] %vm44_vm0, %v171_v1 }
 0x1ae   :  { %178 = vsyncpa [#allocation4], 1 }

// kernel: _lambda_.9
= control target key start
LH: loop header
LB: loop body
LE: loop exit
PB: predicated region body
PF: predicated region fallthrough
CT: control target
= control target key end

     0   :  { %s352_s6 = smov 0   ;;  %s387_s0 = inlined_call_operand.vmem [shape: bf16[2,8,96], index: 0, kind: input, shape index: {}]   ;;  %s388_s1 = inlined_call_operand.vmem [shape: bf16[2,8,32], index: 1, kind: output, shape index: {}]  }
   0x1 LB: > { %s293_s7 = sadd.s32 4294967295, %s334_s6   ;;  %p297_p0 = scmp.ge.s32.totalorder %s334_s6, 1  ;;  %s334_s6 = sphi %s352_s6, %s11_s6  }
   0x2   : > { %p86_p1 = scmp.lt.s32.totalorder %s334_s6, 3 }
   0x4   : > { %p87_p2 = pnand %p297_p0, %p86_p1 }
   0x5   : > { %p104_p3 = scmp.lt.s32.totalorder (!%p87_p2), %s293_s7, 1  ;;  %s336_s12 = smov (!%p87_p2), 96  }
   0x6   : > { %90 = sbr.rel (%p87_p2) target bundleno = 759 (0x2f7), region = 24  ;;  %s337_s13 = smov (!%p87_p2), 80  }
   0x7   : > { %s338_s14 = smov (!%p87_p2), 112   ;;  %s339_s15 = smov (!%p87_p2), 48  }
   0x8   : > { %s340_s16 = smov (!%p87_p2), 64   ;;  %s341_s17 = smov (!%p87_p2), 16  }
   0xb   : > { %s390_s7 = smov (!%p104_p3, %s293_s7), 1  ;;  %vm119_vm0 = vcmask 130048   ;;  %vm140_vm1 = vcmask 64512   ;;  %vm158_vm2 = vcmask 1043456   ;;  %vm238_vm3 = vcmask 257024  }
   0xc   : > { %s298_s8 = sshll.u32 %s390_s7, 2 }
   0xd   : > { %s107_s11 = scalar_lea.vmem %s387_s0, %s298_s8  ;;  %s111_s20 = scalar_lea.vmem %s388_s1, %s298_s8 }
   0xe   : > { %v113_v0 = vld [vmem:[%s107_s11] sm:$0xf] }
   0xf   : > { %v115_v1 = vunpack.c.l.b16 %v113_v0 }
  0x11   : > { %v116_v2 = vpack.c.b16 %v115_v1, %v115_v1 }
  0x13   : > { %117 = vrot.lane.b32.xlu1 %v116_v2, %s336_s12  ;;  %177 = vrot.lane.b32.xlu0 %v116_v2, %s337_s13 }
  0x1b   : > { %175 = vrot.lane.b32.xlu0 %v116_v2, %s338_s14 }
  0x23   : > { %211 = vrot.lane.b32.xlu0 %v116_v2, %s339_s15 }
  0x2b   : > { %153 = vrot.lane.b32.xlu0 %v116_v2, %s340_s16 }
  0x85   : > { %v118_v3 = vpop.permute.xlu1 %117  ;;  %v178_v4 = vpop.permute.xlu0 %177 }
  0x86   : > { %v124_v5 = vsel %vm119_vm0, %v118_v3, 0  ;;  %v183_v6 = vsel %vm119_vm0, %v178_v4, 0 }
  0x87   : > { %133 = vmatpush.bf16.xpose.msra.mxu0 %v124_v5  ;;  %192 = vmatpush.bf16.xpose.msra.mxu2 %v183_v6 }
  0x8d   : > { %v176_v7 = vpop.permute.xlu0 %175 }
  0x8e   : > { %300 = vmatmul.msk.bf16.vlgmr.msra.gmra.mxu0 %vm119_vm0, %v113_v0  ;;  %302 = vmatmul.msk.bf16.vlgmr.msra.gmra.mxu2 %vm119_vm0, %v176_v7 }
  0x95   : > { %v212_v26 = vpop.permute.xlu0 %211 }
  0x96   : > { %v217_v27 = vsel %vm158_vm2, %v212_v26, 0 }
  0x97   : > { %226 = vmatpush.bf16.msra.mxu3 %v217_v27 }
  0x9d   : > { %v154_v28 = vpop.permute.xlu0 %153 }
  0x9e   : > { %v160_v29 = vsel %vm158_vm2, %v154_v28, 0 }
  0x9f   : > { %169 = vmatpush.bf16.msra.mxu1 %v160_v29 }
 0x10b   : > { %v135_v8 = vpop.f32.mrf.mxu0 }
 0x10c   : > { %v139_v9 = vmul.f32 0.25, %v135_v8 }
 0x10e   : > { %v141_v10 = vsel %vm140_vm1, %v139_v9, -inf }
 0x10f   : > { %142 = vmax.xlane.f32.xlu2 %v141_v10 }
 0x111   : > { %v194_v11 = vpop.f32.mrf.mxu2 }
 0x112   : > { %v198_v12 = vmul.f32 0.25, %v194_v11 }
 0x113   : > { %v137_v13 = vpop.f32.mrf.mxu0 }
 0x114   : > { %v199_v14 = vsel %vm140_vm1, %v198_v12, -inf }
 0x115   : > { %200 = vmax.xlane.f32.xlu1 %v199_v14 }
 0x119   : > { %v196_v15 = vpop.f32.mrf.mxu2 }
 0x182   : > { %v143_v16 = vpop.xlane.xlu2 %142 }
 0x183   : > { %v144_v19 = vsub.f32 %v139_v9, %v143_v16 }
 0x185   : > { %v145_v21 = vmul.f32 1.442695, %v144_v19 }
 0x188   : > { %v201_v17 = vpop.xlane.xlu1 %200 }
 0x189   : > { %v202_v18 = vsub.f32 %v198_v12, %v201_v17 }
 0x18b   : > { %v203_v20 = vmul.f32 1.442695, %v202_v18 }
 0x18d   : > { %320 = vpow2.f32 %v203_v20 }
 0x18e   : > { %322 = vpow2.f32 %v145_v21 }
 0x193   : > { %v321_v22 = vpop.eup %320 }
 0x194   : > { %v205_v23 = vsel %vm140_vm1, %v321_v22, 0.0  ;;  %v323_v24 = vpop.eup %322 }
 0x195   : > { %206 = vadd.xlane.f32.xlu2 %v205_v23  ;;  %v147_v25 = vsel %vm140_vm1, %v323_v24, 0.0 }
 0x19d   : > { %148 = vadd.xlane.f32.xlu2 %v147_v25 }
 0x208   : > { %v207_v30 = vpop.xlane.xlu2 %206 }
 0x209   : > { %324 = vrcp.f32 %v207_v30 }
 0x20f   : > { %v325_v31 = vpop.eup %324 }
 0x210   : > { %v149_v32 = vpop.xlane.xlu2 %148  ;;  %v209_v33 = vmul.f32 %v325_v31, %v321_v22 }
 0x211   : > { %326 = vrcp.f32 %v149_v32 }
 0x212   : > { %v210_v34 = vpack.c.bf16 %v209_v33, %v209_v33 }
 0x214   : > { %303 = vmatmul.msk.bf16.vlgmr.msra.gmra.mxu3 %vm140_vm1, %v210_v34 }
 0x217   : > { %v327_v35 = vpop.eup %326 }
 0x218   : > { %v151_v36 = vmul.f32 %v327_v35, %v323_v24 }
 0x21a   : > { %v152_v37 = vpack.c.bf16 %v151_v36, %v151_v36 }
 0x21c   : > { %301 = vmatmul.msk.bf16.vlgmr.msra.gmra.mxu1 %vm140_vm1, %v152_v37 }
 0x297   : > { %v228_v38 = vpop.f32.mrf.mxu3 }
 0x298   : > { %233 = vrot.lane.b32.xlu2 %v228_v38, %s341_s17 }
 0x299   : > { %v171_v39 = vpop.f32.mrf.mxu1 }
 0x29f   : > { %v230_v40 = vpop.f32.mrf.mxu3 }
 0x2a1   : > { %v173_v41 = vpop.f32.mrf.mxu1 }
 0x2f2   : > { %v234_v42 = vpop.permute.xlu2 %233 }
 0x2f3   : > { %v236_v43 = vsel %vm119_vm0, %v171_v39, %v234_v42 }
 0x2f4   : > { %v237_v44 = vpack.c.bf16 %v236_v43, %v236_v43 }
 0x2f6   : > { %239 = vst.msk [vmem:[%s111_s20] sm:$0xf] %vm238_vm3, %v237_v44 }
 0x2f7 PF: > { %s11_s6 = sadd.s32 1, %s334_s6  }
 0x2f8   : > { %p8_p4 = scmp.ge.s32.totalorder %s11_s6, 4  }
 0x2fa   :  { %10 = sbr.rel (!%p8_p4) target bundleno = 1 (0x1), region = 54 }

// kernel: _lambda_.7
= control target key start
LH: loop header
LB: loop body
LE: loop exit
PB: predicated region body
PF: predicated region fallthrough
CT: control target
= control target key end

     0   :  { %9 = vsyncpa [#allocation3], 0  ;;  %s578_s0 = inlined_call_operand.hbm [shape: f32[16,32], index: 0, kind: input, shape index: {}]   ;;  %s579_s1 = inlined_call_operand.vmem [shape: f32[8,32], index: 1, kind: input, shape index: {}]   ;;  %s580_s2 = inlined_call_operand.vmem [shape: f32[1,32], index: 2, kind: input, shape index: {}]   ;;  %s581_s3 = inlined_call_operand.vmem [shape: f32[1,32], index: 3, kind: input, shape index: {}]   ;;  %s582_s4 = inlined_call_operand.vmem [shape: f32[16,32], index: 4, kind: output, shape index: {}]  }
   0x1   :  { %11 = vsyncpa [#allocation3 + $0x1], 0  ;;  %s472_s15 = smov 0   ;;  %s474_s16 = smov 0  }
   0x2   :  { %s476_s17 = smov 0   ;;  %s478_s18 = smov 0  }
   0x3 LB: > { %s491_s19 = sadd.s32 4294967295, %s444_s18   ;;  %s494_s20 = sadd.s32 1, %s444_s18   ;;  %s444_s18 = sphi %s478_s18, %s589_s18   ;;  %s440_s17 = sphi %s476_s17, %s588_s17   ;;  %s436_s16 = sphi %s474_s16, %s587_s16   ;;  %s432_s15 = sphi %s472_s15, %s586_s15  }
   0x4   : > { %s21_s21 = ssub.s32 %s444_s18, %s494_s20  ;;  %s24_s22 = sadd.s32 1, %s440_s17 }
   0x5   : > { %p22_p0 = scmp.eq.s32.totalorder %s21_s21, 0  ;;  %p31_p1 = scmp.ne.s32.totalorder %s440_s17, %s436_s16 }
   0x6   : > { %p32_p2 = scmp.eq.s32.totalorder %s444_s18, 0  ;;  %p37_p3 = scmp.ne.s32.totalorder %s436_s16, %s432_s15 }
   0x7   : > { %s504_s23 = scalar_select %p22_p0, %s440_s17, %s24_s22  }
   0x8   : > { %p506_p4 = por %p32_p2, %p31_p1  ;;  %p38_p5 = scmp.eq.s32.totalorder %s491_s19, 0 }
   0x9   : > { %p340_p6 = scmp.lt.s32.totalorder %s444_s18, 2  ;;  %s159_s26 = sand.u32 1, %s440_s17  }
   0xa   : > { %p512_p7 = por %p38_p5, %p37_p3  ;;  %s327_s27 = sshll.u32 %s159_s26, 3 }
   0xb   : > { %s328_s28 = sshll.u32 %s444_s18, 3  ;;  %s163_s6 = scalar_lea.vmem [#allocation2], %s327_s27 }
   0xc   : > { %s167_s5 = scalar_lea.hbm %s578_s0, %s328_s28  ;;  %s171_s7 = sshll.u32 %s163_s6, 4  ;;  %s172_s7 = int_to_ptr.vmem [resolvable:$true] %s171_s7 }
   0xd   : > { %s169_s8 = sshll.u32 %s167_s5, 4  ;;  %p523_p8 = pnand %p340_p6, %p506_p4  ;;  %s170_s8 = int_to_ptr.hbm [resolvable:$true] %s169_s8 }
   0xe   : > { %p329_p9 = scmp.ge.s32.totalorder %s444_s18, 1  ;;  %p176_p10 = scmp.lt.s32.totalorder %s444_s18, 3 }
   0xf   : > { %s160_s10 = scalar_lea.sflag [#allocation3], %s159_s26  ;;  %s380_s11 = sshra.s32 %s170_s8, 4  ;;  %s381_s11 = int_to_ptr.hbm [resolvable:$true] %s380_s11 }
  0x10   : > { %s382_s12 = scalar_lea.hbm %s381_s11, 8  ;;  %p384_p12 = pneg %p523_p8 }
  0x11   : > { %p383_p11 = scmp.ne.s32.totalorder %s381_s11, %s382_s12  ;;  %s387_s15 = scalar_lea.hbm %s578_s0, 16 }
  0x12   : > { %p388_p1 = scmp.lt.s32.totalorder %s381_s11, %s578_s0  ;;  %p389_p2 = scmp.lt.s32.totalorder %s387_s15, %s382_s12 }
  0x13   : > { %p385_p13 = pnand %p384_p12, %p383_p11 }
  0x14   : > { %p390_p3 = por %p389_p2, %p388_p1 }
  0x15   : > { %p386_p0 = pneg %p385_p13 }
  0x17   : > { %p391_p4 = pnand %p390_p3, %p386_p0 }
  0x19   : > { %394 = shalt.err (!%p391_p4)
}
  0x1a   : > { %339 = dma.hbm_to_vmem [thread:$0]  (!%p523_p8), %s170_s8, 128, %s172_s7, %s160_s10  }
  0x1b   : > { %p177_p5 = pnand %p329_p9, %p176_p10 }
  0x1c   : > { %s182_s24 = sand.u32 (!%p177_p5), 1, %s436_s16  }
  0x1d   : > { %180 = sbr.rel (%p177_p5) target bundleno = 308 (0x134), region = 36  ;;  %s330_s26 = sshll.u32 (!%p177_p5), %s182_s24, 3 }
  0x1e   : > { %s183_s27 = scalar_lea.sflag (!%p177_p5), [#allocation3], %s182_s24  ;;  %s186_s28 = scalar_lea.vmem (!%p177_p5), [#allocation2], %s330_s26 }
  0x22   : > { %427 = dma.done.wait (%p512_p7), %s183_s27, 128  }
  0x23   : > { %429 = vsyncadd (%p512_p7), %s183_s27, 4294967168  ;;  %v215_v0 = vld [vmem:[%s186_s28] sm:$0xff]  ;;  %vm218_vm0 = vcmask 261120   ;;  %v446_v4 = vmov 32.0   ;;  %p211_p6 = scmp.lt.s32.totalorder %s491_s19, 1 }
  0x24   : > { %v216_v1 = vld [vmem:[%s579_s1] sm:$0xff]  ;;  %376 = vrcp.f32 %v446_v4 }
  0x25   : > { %v217_v2 = vadd.f32 %v216_v1, %v215_v0  ;;  %s591_s19 = smov (!%p211_p6, %s491_s19), 1  ;;  %v374_v25 = vld [vmem:[%s580_s2] ss:$0 sm:$0xff] }
  0x26   : > { %s331_s5 = sshll.u32 %s591_s19, 3  ;;  %v375_v27 = vld [vmem:[%s581_s3] ss:$0 sm:$0xff] }
  0x27   : > { %v219_v3 = vsel %vm218_vm0, %v217_v2, 0.0  ;;  %s214_s10 = scalar_lea.vmem %s582_s4, %s331_s5 }
  0x28   : > { %220 = vadd.xlane.f32.xlu0 %v219_v3 }
  0x2a   : > { %v377_v5 = vpop.eup %376 }
  0x2b   : > { %v223_v6 = vmul.f32 32.0, %v377_v5  ;;  %vm227_vm1 = vweird.f32 %v377_v5 }
  0x2d   : > { %v224_v7 = vsub.f32 1.0, %v223_v6 }
  0x2f   : > { %v225_v8 = vmul.f32 %v377_v5, %v224_v7 }
  0x31   : > { %v226_v9 = vadd.f32 %v377_v5, %v225_v8 }
  0x33   : > { %v228_v10 = vsel %vm227_vm1, %v377_v5, %v226_v9 }
  0x9b   : > { %v221_v11 = vpop.xlane.xlu0 %220 }
  0x9c   : > { %v229_v12 = vmul.f32 %v228_v10, %v221_v11 }
  0x9e   : > { %v230_v13 = vsub.f32 %v217_v2, %v229_v12 }
  0xa0   : > { %v231_v14 = vmul.f32 %v230_v13, %v230_v13 }
  0xa2   : > { %v232_v15 = vsel %vm218_vm0, %v231_v14, 0.0 }
  0xa3   : > { %233 = vadd.xlane.f32.xlu0 %v232_v15 }
 0x116   : > { %v234_v16 = vpop.xlane.xlu0 %233 }
 0x117   : > { %v235_v17 = vmul.f32 %v234_v16, %v228_v10 }
 0x119   : > { %v236_v18 = vadd.f32 1e-12, %v235_v17 }
 0x11b   : > { %378 = vrsqrt.f32 %v236_v18  ;;  %vm243_vm3 = vweird.f32 %v236_v18 }
 0x121   : > { %v379_v19 = vpop.eup %378 }
 0x122   : > { %v238_v20 = vmul.f32 %v379_v19, %v236_v18  ;;  %vm244_vm2 = vweird.f32 %v379_v19 }
 0x123   : > { %vm245_vm4 = vmor %vm243_vm3, %vm244_vm2 }
 0x124   : > { %v239_v21 = vmul.f32 %v379_v19, %v238_v20 }
 0x126   : > { %v240_v22 = vmul.f32 0.5, %v239_v21 }
 0x128   : > { %v241_v23 = vsub.f32 1.5, %v240_v22 }
 0x12a   : > { %v242_v24 = vmul.f32 %v379_v19, %v241_v23 }
 0x12c   : > { %v246_v26 = vsel %vm245_vm4, %v379_v19, %v242_v24 }
 0x12d   : > { %v247_v28 = vmul.f32 %v246_v26, %v230_v13 }
 0x12f   : > { %v252_v29 = vmul.f32 %v374_v25, %v247_v28 }
 0x131   : > { %v257_v30 = vadd.f32 %v375_v27, %v252_v29 }
 0x133   : > { %258 = vst.msk [vmem:[%s214_s10] sm:$0xff] %vm218_vm0, %v257_v30 }
 0x134 PF: > { %p14_p7 = scmp.ge.s32.totalorder %s494_s20, 4   ;;  %s586_s15 = smov %s436_s16 }
 0x135   : > { %s587_s16 = smov %s440_s17  ;;  %s588_s17 = smov %s504_s23 }
 0x136   : > { %s589_s18 = smov %s494_s20  ;;  %16 = sbr.rel (!%p14_p7) target bundleno = 3 (0x3), region = 76 }
 0x13b   :  { %278 = vsyncpa [#allocation3], 1 }
 0x13c   :  { %280 = vsyncpa [#allocation3 + $0x1], 1 }

// kernel: _lambda_.8
= control target key start
LH: loop header
LB: loop body
LE: loop exit
PB: predicated region body
PF: predicated region fallthrough
CT: control target
= control target key end

     0   :  { %8 = vsyncpa [#allocation4], 0  ;;  %s145_s15 = smov [#allocation3]   ;;  %s146_s17 = smov 64   ;;  %s191_s0 = inlined_call_operand.vmem [shape: f32[16,32], index: 0, kind: input, shape index: {}]   ;;  %s192_s1 = inlined_call_operand.hbm [shape: bf16[32,96], index: 1, kind: input, shape index: {}]   ;;  %s193_s2 = inlined_call_operand.vmem [shape: f32[1,96], index: 2, kind: input, shape index: {}]   ;;  %s194_s3 = inlined_call_operand.vmem [shape: bf16[16,96], index: 3, kind: output, shape index: {}]  }
   0x1   :  { %s15_s14 = sshll.u32 %s192_s1, 4  ;;  %s17_s16 = sshll.u32 %s145_s15, 4  ;;  %s16_s14 = int_to_ptr.hbm [resolvable:$true] %s15_s14  ;;  %s18_s16 = int_to_ptr.vmem [resolvable:$true] %s17_s16 }
   0x2   :  { %s147_s18 = smov 4  }
   0x3   :  { %23 = dma.hbm_to_vmem [thread:$0]  %s16_s14, 256, %s18_s16, [#allocation4], %s146_s17, %s146_s17, %s147_s18  }
   0x4   :  { %143 = dma.done.wait [#allocation4], 256  }
   0x5   :  { %144 = vsyncadd [#allocation4], 4294967040  ;;  %vm35_vm0 = vcmask 785408   ;;  %v148_v0 = vmov 0.0   ;;  %v113_v1 = vld [vmem:[#allocation3 + $0x8] sm:$0xff]  ;;  %v112_v2 = vld [vmem:[#allocation3] sm:$0xff] }
   0x6   :  { %36 = vst.msk [vmem:[#allocation2] sm:$0xff] %vm35_vm0, %v148_v0  ;;  %69 = vmatpush.bf16.msra.mxu0 %v113_v1  ;;  %v40_v3 = vld [vmem:[%s191_s0] sm:$0xff]  ;;  %v41_v4 = vld [vmem:[%s191_s0 + $0x8] sm:$0xff]  ;;  %vm59_vm1 = vcmask 261120   ;;  %vm95_vm2 = vcmask 781312  }
   0x7   :  { %37 = vst.msk [vmem:[#allocation2 + $0x8] sm:$0xff] %vm35_vm0, %v148_v0  ;;  %v42_v5 = vpack.c.bf16 %v41_v4, %v40_v3  ;;  %v118_v10 = vld [vmem:[%s193_s2] ss:$0 sm:$0xff] }
   0xa   :  { %70 = vmatpush.bf16.msra.mxu0 %v112_v2 }
   0xd   :  { %111 = vmatmul.msk.bf16.vlgmr.msra.gmra.mxu0 %vm59_vm1, %v42_v5  ;;  %v38_v6 = vld [vmem:[#allocation2] sm:$0xff] }
   0xe   :  { %v39_v9 = vld [vmem:[#allocation2 + $0x8] sm:$0xff] }
  0x8a   :  { %v72_v7 = vpop.f32.mrf.mxu0 }
  0x8b   :  { %v77_v8 = vadd.f32 %v72_v7, %v38_v6 }
  0x8d   :  { %80 = vst.msk [vmem:[#allocation2] sm:$0xff] %vm35_vm0, %v77_v8 }
  0x92   :  { %v74_v11 = vpop.f32.mrf.mxu0 }
  0x93   :  { %v78_v12 = vadd.f32 %v74_v11, %v39_v9 }
  0x94   :  { %v85_v13 = vld [vmem:[#allocation2] sm:$0xff] }
  0x95   :  { %v91_v14 = vadd.f32 %v118_v10, %v85_v13  ;;  %81 = vst.msk [vmem:[#allocation2 + $0x8] sm:$0xff] %vm35_vm0, %v78_v12 }
  0x97   :  { %v93_v15 = vpack.c.bf16 %v91_v14, %v91_v14 }
  0x99   :  { %96 = vst.msk [vmem:[%s194_s3] sm:$0xf] %vm95_vm2, %v93_v15 }
  0x9c   :  { %v86_v16 = vld [vmem:[#allocation2 + $0x8] sm:$0xff] }
  0x9d   :  { %v92_v17 = vadd.f32 %v118_v10, %v86_v16 }
  0x9f   :  { %v94_v18 = vpack.c.bf16 %v92_v17, %v92_v17 }
  0xa1   :  { %97 = vst.msk [vmem:[%s194_s3 + $0x4] sm:$0xf] %vm95_vm2, %v94_v18 }
  0xa2   :  { %102 = vsyncpa [#allocation4], 1 }

// kernel: _lambda_.11
= control target key start
LH: loop header
LB: loop body
LE: loop exit
PB: predicated region body
PF: predicated region fallthrough
CT: control target
= control target key end

     0   :  { %8 = vsyncpa [#allocation4], 0  ;;  %s239_s15 = smov [#allocation3]   ;;  %s240_s17 = smov 64   ;;  %s298_s0 = inlined_call_operand.vmem [shape: f32[16,32], index: 0, kind: input, shape index: {}]   ;;  %s299_s1 = inlined_call_operand.hbm [shape: bf16[32,64], index: 1, kind: input, shape index: {}]   ;;  %s300_s2 = inlined_call_operand.vmem [shape: f32[1,64], index: 2, kind: input, shape index: {}]   ;;  %s301_s3 = inlined_call_operand.vmem [shape: bf16[16,64], index: 3, kind: output, shape index: {}]  }
   0x1   :  { %s15_s14 = sshll.u32 %s299_s1, 4  ;;  %s17_s16 = sshll.u32 %s239_s15, 4  ;;  %s16_s14 = int_to_ptr.hbm [resolvable:$true] %s15_s14  ;;  %s18_s16 = int_to_ptr.vmem [resolvable:$true] %s17_s16 }
   0x2   :  { %s241_s18 = smov 4  }
   0x3   :  { %23 = dma.hbm_to_vmem [thread:$0]  %s16_s14, 256, %s18_s16, [#allocation4], %s240_s17, %s240_s17, %s241_s18  }
   0x4   :  { %237 = dma.done.wait [#allocation4], 256  }
   0x5   :  { %238 = vsyncadd [#allocation4], 4294967040  ;;  %vm35_vm0 = vcmask 523264   ;;  %v242_v0 = vmov 0.0   ;;  %v203_v1 = vld [vmem:[#allocation3 + $0x8] sm:$0xff]  ;;  %v202_v2 = vld [vmem:[#allocation3] sm:$0xff] }
   0x6   :  { %36 = vst.msk [vmem:[#allocation2] sm:$0xff] %vm35_vm0, %v242_v0  ;;  %69 = vmatpush.bf16.msra.mxu0 %v203_v1  ;;  %v40_v3 = vld [vmem:[%s298_s0] sm:$0xff]  ;;  %v41_v4 = vld [vmem:[%s298_s0 + $0x8] sm:$0xff]  ;;  %vm59_vm1 = vcmask 261120   ;;  %vm183_vm9 = vcmask 519168  }
   0x7   :  { %37 = vst.msk [vmem:[#allocation2 + $0x8] sm:$0xff] %vm35_vm0, %v242_v0  ;;  %v42_v5 = vpack.c.bf16 %v41_v4, %v40_v3  ;;  %v208_v10 = vld [vmem:[%s300_s2] ss:$0 sm:$0xff] }
   0xa   :  { %70 = vmatpush.bf16.msra.mxu0 %v202_v2 }
   0xd   :  { %199 = vmatmul.msk.bf16.vlgmr.msra.gmra.mxu0 %vm59_vm1, %v42_v5  ;;  %v38_v6 = vld [vmem:[#allocation2] sm:$0xff] }
   0xe   :  { %v39_v9 = vld [vmem:[#allocation2 + $0x8] sm:$0xff] }
  0x8a   :  { %v72_v7 = vpop.f32.mrf.mxu0 }
  0x8b   :  { %v77_v8 = vadd.f32 %v72_v7, %v38_v6 }
  0x8d   :  { %80 = vst.msk [vmem:[#allocation2] sm:$0xff] %vm35_vm0, %v77_v8 }
  0x92   :  { %v74_v11 = vpop.f32.mrf.mxu0 }
  0x93   :  { %v78_v12 = vadd.f32 %v74_v11, %v39_v9 }
  0x94   :  { %v85_v13 = vld [vmem:[#allocation2] sm:$0xff] }
  0x95   :  { %v278_v14 = vadd.f32 %v208_v10, %v85_v13  ;;  %81 = vst.msk [vmem:[#allocation2 + $0x8] sm:$0xff] %vm35_vm0, %v78_v12 }
  0x97   :  { %v95_v15 = vmul.f32 0.70710677, %v278_v14 }
  0x99   :  { %v97_v16 = vmul.f32 %v95_v15, %v95_v15 }
  0x9b   :  { %v98_v17 = vmin.f32 %v97_v16, 16.0 }
  0x9c   :  { %v86_v18 = vld [vmem:[#allocation2 + $0x8] sm:$0xff] }
  0x9d   :  { %v99_v19 = vmul.f32 2.1237322e-06, %v98_v17  ;;  %v110_v20 = vmul.f32 3.8918573e-05, %v98_v17  ;;  %v282_v21 = vadd.f32 %v208_v10, %v86_v18 }
  0x9f   :  { %v100_v22 = vadd.f32 0.00028619796, %v99_v19  ;;  %v111_v23 = vadd.f32 0.001143296, %v110_v20  ;;  %v285_v24 = vmul.f32 0.70710677, %v282_v21 }
  0xa0   :  { %v93_v20 = vmul.f32 0.5, %v278_v14  ;;  %v94_v14 = vmul.f32 0.5, %v282_v21 }
  0xa1   :  { %v101_v25 = vmul.f32 %v100_v22, %v98_v17  ;;  %v112_v26 = vmul.f32 %v111_v23, %v98_v17  ;;  %v137_v27 = vmul.f32 %v285_v24, %v285_v24 }
  0xa3   :  { %v113_v28 = vadd.f32 0.014752088, %v112_v26  ;;  %v102_v29 = vadd.f32 0.0036580483, %v101_v25  ;;  %v138_v30 = vmin.f32 %v137_v27, 16.0 }
  0xa5   :  { %v114_v31 = vmul.f32 %v113_v28, %v98_v17  ;;  %v139_v32 = vmul.f32 2.1237322e-06, %v138_v30  ;;  %v150_v33 = vmul.f32 3.8918573e-05, %v138_v30  ;;  %v103_v35 = vmul.f32 %v102_v29, %v98_v17 }
  0xa7   :  { %v115_v34 = vadd.f32 0.112945676, %v114_v31  ;;  %v140_v36 = vadd.f32 0.00028619796, %v139_v32  ;;  %v151_v37 = vadd.f32 0.001143296, %v150_v33 }
  0xa8   :  { %v104_v42 = vadd.f32 0.05243302, %v103_v35 }
  0xa9   :  { %v116_v38 = vmul.f32 %v115_v34, %v98_v17  ;;  %v141_v39 = vmul.f32 %v140_v36, %v138_v30  ;;  %v152_v40 = vmul.f32 %v151_v37, %v138_v30 }
  0xaa   :  { %v105_v48 = vmul.f32 %v104_v42, %v98_v17 }
  0xab   :  { %v117_v41 = vadd.f32 0.4994258, %v116_v38  ;;  %v153_v43 = vadd.f32 0.014752088, %v152_v40  ;;  %v142_v45 = vadd.f32 0.0036580483, %v141_v39 }
  0xac   :  { %v106_v52 = vadd.f32 0.18741608, %v105_v48 }
  0xad   :  { %v118_v44 = vmul.f32 %v117_v41, %v98_v17  ;;  %v154_v46 = vmul.f32 %v153_v43, %v138_v30  ;;  %v143_v50 = vmul.f32 %v142_v45, %v138_v30 }
  0xae   :  { %v107_v57 = vmul.f32 %v106_v52, %v98_v17 }
  0xaf   :  { %v119_v47 = vadd.f32 1.0, %v118_v44  ;;  %v155_v49 = vadd.f32 0.112945676, %v154_v46  ;;  %v144_v54 = vadd.f32 0.05243302, %v143_v50 }
  0xb0   :  { %v108_v63 = vadd.f32 1.1283791, %v107_v57 }
  0xb1   :  { %209 = vrcp.f32 %v119_v47  ;;  %v156_v51 = vmul.f32 %v155_v49, %v138_v30  ;;  %v145_v60 = vmul.f32 %v144_v54, %v138_v30  ;;  %v131_v62 = vand.u32 2147483648, %v119_v47 }
  0xb2   :  { %v129_v1 = vand.u32 2147483647, %v119_v47  ;;  %vm125_vm3 = vweird.f32 %v119_v47  ;;  %v109_v6 = vmul.f32 %v108_v63, %v95_v15 }
  0xb3   :  { %v157_v53 = vadd.f32 0.4994258, %v156_v51  ;;  %v146_v2 = vadd.f32 0.18741608, %v145_v60  ;;  %v132_v4 = vor.u32 1.1754944e-38, %v131_v62 }
  0xb4   :  { %vm130_vm5 = vcmp.eq.f32.partialorder %v129_v1, 8.507059e+37 }
  0xb5   :  { %v158_v55 = vmul.f32 %v157_v53, %v138_v30  ;;  %v147_v9 = vmul.f32 %v146_v2, %v138_v30 }
  0xb7   :  { %v210_v56 = vpop.eup %209  ;;  %v159_v59 = vadd.f32 1.0, %v158_v55  ;;  %v148_v17 = vadd.f32 1.1283791, %v147_v9 }
  0xb8   :  { %v121_v58 = vmul.f32 %v210_v56, %v119_v47  ;;  %vm126_vm2 = vweird.f32 %v210_v56 }
  0xb9   :  { %211 = vrcp.f32 %v159_v59  ;;  %vm127_vm4 = vmor %vm125_vm3, %vm126_vm2  ;;  %v171_v16 = vand.u32 2147483648, %v159_v59  ;;  %v169_v19 = vand.u32 2147483647, %v159_v59  ;;  %vm165_vm7 = vweird.f32 %v159_v59 }
  0xba   :  { %v122_v61 = vsub.f32 1.0, %v121_v58  ;;  %v149_v26 = vmul.f32 %v148_v17, %v285_v24 }
  0xbb   :  { %v172_v15 = vor.u32 1.1754944e-38, %v171_v16  ;;  %vm170_vm10 = vcmp.eq.f32.partialorder %v169_v19, 8.507059e+37 }
  0xbc   :  { %v123_v0 = vmul.f32 %v210_v56, %v122_v61 }
  0xbe   :  { %v124_v3 = vadd.f32 %v210_v56, %v123_v0 }
  0xbf   :  { %v212_v5 = vpop.eup %211 }
  0xc0   :  { %v128_v7 = vsel %vm127_vm4, %v210_v56, %v124_v3  ;;  %v161_v10 = vmul.f32 %v212_v5, %v159_v59  ;;  %vm166_vm6 = vweird.f32 %v212_v5 }
  0xc1   :  { %v133_v8 = vsel %vm130_vm5, %v132_v4, %v128_v7  ;;  %vm167_vm8 = vmor %vm165_vm7, %vm166_vm6 }
  0xc2   :  { %v134_v11 = vmul.f32 %v133_v8, %v109_v6  ;;  %v162_v12 = vsub.f32 1.0, %v161_v10 }
  0xc4   :  { %v200_v13 = vclamps-f32 %v134_v11, 1.0  ;;  %v163_v18 = vmul.f32 %v212_v5, %v162_v12 }
  0xc6   :  { %v177_v22 = vadd.f32 1.0, %v200_v13  ;;  %v164_v23 = vadd.f32 %v212_v5, %v163_v18 }
  0xc8   :  { %v179_v25 = vmul.f32 %v177_v22, %v93_v20  ;;  %v168_v27 = vsel %vm167_vm8, %v212_v5, %v164_v23 }
  0xc9   :  { %v173_v29 = vsel %vm170_vm10, %v172_v15, %v168_v27 }
  0xca   :  { %v181_v28 = vpack.c.bf16 %v179_v25, %v179_v25  ;;  %v174_v30 = vmul.f32 %v173_v29, %v149_v26 }
  0xcc   :  { %184 = vst.msk [vmem:[%s301_s3] sm:$0xf] %vm183_vm9, %v181_v28  ;;  %v201_v31 = vclamps-f32 %v174_v30, 1.0 }
  0xce   :  { %v178_v32 = vadd.f32 1.0, %v201_v31 }
  0xd0   :  { %v180_v33 = vmul.f32 %v178_v32, %v94_v14 }
  0xd2   :  { %v182_v34 = vpack.c.bf16 %v180_v33, %v180_v33 }
  0xd4   :  { %185 = vst.msk [vmem:[%s301_s3 + $0x4] sm:$0xf] %vm183_vm9, %v182_v34 }
  0xd5   :  { %190 = vsyncpa [#allocation4], 1 }

// kernel: _lambda_.13
= control target key start
LH: loop header
LB: loop body
LE: loop exit
PB: predicated region body
PF: predicated region fallthrough
CT: control target
= control target key end

     0   :  { %vm18_vm0 = vcmask 261120   ;;  %v147_v4 = vmov 8.0   ;;  %s190_s0 = inlined_call_operand.vmem [shape: f32[2,8,32], index: 0, kind: input, shape index: {}]   ;;  %s191_s1 = inlined_call_operand.vmem [shape: bf16[32,4], index: 1, kind: input, shape index: {}]   ;;  %s192_s2 = inlined_call_operand.vmem [shape: f32[1,4], index: 2, kind: input, shape index: {}]   ;;  %s193_s3 = inlined_call_operand.hbm [shape: f32[2,4], index: 3, kind: output, shape index: {}]  }
   0x1   :  { %v115_v0 = vld [vmem:[%s191_s1 + $0x8] sm:$0xff]  ;;  %v16_v1 = vld [vmem:[%s190_s0] sm:$0xff]  ;;  %119 = vrcp.f32 %v147_v4 }
   0x2   :  { %v17_v2 = vld [vmem:[%s190_s0 + $0x8] sm:$0xff]  ;;  %v19_v3 = vsel %vm18_vm0, %v16_v1, 0.0  ;;  %80 = vmatpush.bf16.msra.mxu0 %v115_v0  ;;  %v114_v5 = vld [vmem:[%s191_s1] sm:$0xff] }
   0x3   :  { %v20_v6 = vrot.slane %v19_v3, 4  ;;  %v26_v7 = vsel %vm18_vm0, %v17_v2, 0.0 }
   0x4   :  { %8 = vsyncpa [#allocation3], 0  ;;  %v27_v8 = vrot.slane %v26_v7, 4  ;;  %vm56_vm2 = vcmask 1041409   ;;  %v118_v33 = vld [vmem:[%s192_s2] ss:$0 sm:$0xff] }
   0x5   :  { %v21_v9 = vadd.f32 %v20_v6, %v19_v3  ;;  %s148_s20 = smov [#allocation2]   ;;  %s96_s24 = sshll.u32 %s193_s3, 4  ;;  %vm87_vm3 = vcmask 25600   ;;  %s97_s24 = int_to_ptr.hbm [resolvable:$true] %s96_s24 }
   0x6   :  { %v28_v10 = vadd.f32 %v27_v8, %v26_v7  ;;  %81 = vmatpush.bf16.msra.mxu0 %v114_v5  ;;  %s94_s21 = sshll.u32 %s148_s20, 4  ;;  %s95_s21 = int_to_ptr.vmem [resolvable:$true] %s94_s21 }
   0x7   :  { %v22_v11 = vrot.slane %v21_v9, 2  ;;  %v120_v12 = vpop.eup %119 }
   0x8   :  { %v29_v13 = vrot.slane %v28_v10, 2  ;;  %v34_v15 = vmul.f32 8.0, %v120_v12  ;;  %vm38_vm1 = vweird.f32 %v120_v12 }
   0x9   :  { %v23_v14 = vadd.f32 %v22_v11, %v21_v9 }
   0xa   :  { %v30_v16 = vadd.f32 %v29_v13, %v28_v10  ;;  %v35_v18 = vsub.f32 1.0, %v34_v15 }
   0xb   :  { %v24_v17 = vrot.slane %v23_v14, 1 }
   0xc   :  { %v31_v19 = vrot.slane %v30_v16, 1  ;;  %v36_v20 = vmul.f32 %v120_v12, %v35_v18 }
   0xd   :  { %v25_v21 = vadd.f32 %v24_v17, %v23_v14 }
   0xe   :  { %v32_v22 = vadd.f32 %v31_v19, %v30_v16  ;;  %v37_v23 = vadd.f32 %v120_v12, %v36_v20 }
  0x10   :  { %v39_v24 = vsel %vm38_vm1, %v120_v12, %v37_v23 }
  0x11   :  { %v40_v25 = vmul.f32 %v39_v24, %v25_v21  ;;  %v41_v26 = vmul.f32 %v39_v24, %v32_v22 }
  0x13   :  { %v42_v27 = vpack.c.bf16 %v40_v25, %v40_v25  ;;  %v43_v28 = vpack.c.bf16 %v41_v26, %v41_v26 }
  0x15   :  { %v54_v29 = vunpack.c.l.b16 %v42_v27  ;;  %v55_v30 = vunpack.c.l.b16 %v43_v28 }
  0x17   :  { %v57_v31 = vsel %vm56_vm2, %v55_v30, %v54_v29 }
  0x18   :  { %v58_v32 = vpack.c.b16 %v57_v31, %v57_v31 }
  0x1a   :  { %113 = vmatmul.msk.bf16.vlgmr.msra.gmra.mxu0 %vm18_vm0, %v58_v32 }
  0x97   :  { %v83_v34 = vpop.f32.mrf.mxu0 }
  0x98   :  { %v84_v35 = vadd.f32 %v118_v33, %v83_v34 }
  0x9a   :  { %88 = vst.msk [vmem:[#allocation2] sm:$0x3] %vm87_vm3, %v84_v35 }
  0x9b   :  { %99 = dma.vmem_to_hbm [thread:$0]  %s95_s21, 32, %s97_s24, [#allocation3]  }
  0x9f   :  { %v85_v36 = vpop.f32.mrf.mxu0 }
  0xa0   :  { %145 = dma.done.wait [#allocation3], 32  }
  0xa1   :  { %146 = vsyncadd [#allocation3], 4294967264 }
  0xa2   :  { %104 = vsyncpa [#allocation3], 1 }

// kernel: _lambda_.12
= control target key start
LH: loop header
LB: loop body
LE: loop exit
PB: predicated region body
PF: predicated region fallthrough
CT: control target
= control target key end

     0   :  { %11 = vsyncpa [#allocation4], 0  ;;  %s262_s24 = smov [#allocation3]   ;;  %s263_s26 = smov 64   ;;  %s339_s0 = inlined_call_operand.vmem [shape: bf16[16,64], index: 0, kind: input, shape index: {}]   ;;  %s340_s1 = inlined_call_operand.hbm [shape: bf16[64,32], index: 1, kind: input, shape index: {}]   ;;  %s341_s2 = inlined_call_operand.vmem [shape: f32[1,32], index: 2, kind: input, shape index: {}, may-alias: {2,5}]   ;;  %s342_s3 = inlined_call_operand.vmem [shape: f32[16,32], index: 3, kind: input, shape index: {}]   ;;  %s343_s4 = inlined_call_operand.vmem [shape: f32[1,32], index: 4, kind: input, shape index: {}]   ;;  %s344_s5 = inlined_call_operand.vmem [shape: f32[1,32], index: 5, kind: input, shape index: {}, may-alias: {2,5}]   ;;  %s345_s6 = inlined_call_operand.vmem [shape: f32[16,32], index: 6, kind: output, shape index: {}]  }
   0x1   :  { %s18_s23 = sshll.u32 %s340_s1, 4  ;;  %s20_s25 = sshll.u32 %s262_s24, 4  ;;  %s19_s23 = int_to_ptr.hbm [resolvable:$true] %s18_s23  ;;  %s21_s25 = int_to_ptr.vmem [resolvable:$true] %s20_s25 }
   0x2   :  { %s264_s27 = smov 4  }
   0x3   :  { %26 = dma.hbm_to_vmem [thread:$0]  %s19_s23, 512, %s21_s25, [#allocation4], %s263_s26, %s263_s26, %s264_s27  }
   0x4   :  { %260 = dma.done.wait [#allocation4], 512  }
   0x5   :  { %261 = vsyncadd [#allocation4], 4294966784  ;;  %vm44_vm0 = vcmask 261120   ;;  %v265_v0 = vmov 0.0   ;;  %v221_v1 = vld [vmem:[#allocation3 + $0x18] sm:$0xff]  ;;  %v220_v2 = vld [vmem:[#allocation3 + $0x10] sm:$0xff] }
   0x6   :  { %45 = vst.msk [vmem:[#allocation2] sm:$0xff] %vm44_vm0, %v265_v0  ;;  %96 = vmatpush.bf16.msra.mxu0 %v221_v1  ;;  %v219_v3 = vld [vmem:[#allocation3 + $0x8] sm:$0xff]  ;;  %v218_v4 = vld [vmem:[#allocation3] sm:$0xff]  ;;  %v217_v5 = vld [vmem:[%s339_s0] sm:$0xff]  ;;  %vm88_vm1 = vcmask 523264   ;;  %v266_v23 = vmov 32.0  }
   0x7   :  { %46 = vst.msk [vmem:[#allocation2 + $0x8] sm:$0xff] %vm44_vm0, %v265_v0  ;;  %v227_v10 = vld [vmem:[%s341_s2] ss:$0 sm:$0xff]  ;;  %v123_v19 = vld [vmem:[%s342_s3 + $0x8] sm:$0xff]  ;;  %230 = vrcp.f32 %v266_v23 }
   0x8   :  { %v122_v14 = vld [vmem:[%s342_s3] sm:$0xff] }
   0x9   :  { %v228_v54 = vld [vmem:[%s343_s4] ss:$0 sm:$0xff] }
   0xa   :  { %97 = vmatpush.bf16.msra.mxu0 %v220_v2  ;;  %v229_v57 = vld [vmem:[%s344_s5] ss:$0 sm:$0xff] }
   0xd   :  { %v47_v6 = vld [vmem:[#allocation2] sm:$0xff]  ;;  %v231_v24 = vpop.eup %230 }
   0xe   :  { %98 = vmatpush.bf16.msra.mxu0 %v219_v3  ;;  %v48_v9 = vld [vmem:[#allocation2 + $0x8] sm:$0xff]  ;;  %v133_v25 = vmul.f32 32.0, %v231_v24  ;;  %vm137_vm2 = vweird.f32 %v231_v24 }
  0x10   :  { %v134_v26 = vsub.f32 1.0, %v133_v25 }
  0x12   :  { %99 = vmatpush.bf16.msra.mxu0 %v218_v4  ;;  %v135_v27 = vmul.f32 %v231_v24, %v134_v26 }
  0x14   :  { %v136_v28 = vadd.f32 %v231_v24, %v135_v27 }
  0x15   :  { %216 = vmatmul.msk.bf16.vlgmr.msra.gmra.mxu0 %vm88_vm1, %v217_v5 }
  0x16   :  { %v138_v29 = vsel %vm137_vm2, %v231_v24, %v136_v28 }
  0x92   :  { %v101_v7 = vpop.f32.mrf.mxu0 }
  0x93   :  { %v106_v8 = vadd.f32 %v101_v7, %v47_v6 }
  0x95   :  { %109 = vst.msk [vmem:[#allocation2] sm:$0xff] %vm44_vm0, %v106_v8 }
  0x9a   :  { %v103_v11 = vpop.f32.mrf.mxu0 }
  0x9b   :  { %v107_v12 = vadd.f32 %v103_v11, %v48_v9 }
  0x9c   :  { %v114_v13 = vld [vmem:[#allocation2] sm:$0xff] }
  0x9d   :  { %110 = vst.msk [vmem:[#allocation2 + $0x8] sm:$0xff] %vm44_vm0, %v107_v12  ;;  %v120_v15 = vadd.f32 %v227_v10, %v114_v13 }
  0x9f   :  { %v124_v16 = vadd.f32 %v122_v14, %v120_v15 }
  0xa1   :  { %v126_v17 = vsel %vm44_vm0, %v124_v16, 0.0 }
  0xa2   :  { %127 = vadd.xlane.f32.xlu0 %v126_v17 }
  0xa4   :  { %v115_v18 = vld [vmem:[#allocation2 + $0x8] sm:$0xff] }
  0xa5   :  { %v121_v20 = vadd.f32 %v227_v10, %v115_v18 }
  0xa7   :  { %v125_v21 = vadd.f32 %v123_v19, %v121_v20 }
  0xa9   :  { %v129_v22 = vsel %vm44_vm0, %v125_v21, 0.0 }
  0xaa   :  { %130 = vadd.xlane.f32.xlu0 %v129_v22 }
 0x115   :  { %v128_v30 = vpop.xlane.xlu0 %127 }
 0x116   :  { %v139_v31 = vmul.f32 %v138_v29, %v128_v30 }
 0x118   :  { %v141_v32 = vsub.f32 %v124_v16, %v139_v31 }
 0x11a   :  { %v143_v33 = vmul.f32 %v141_v32, %v141_v32 }
 0x11c   :  { %v145_v34 = vsel %vm44_vm0, %v143_v33, 0.0 }
 0x11d   :  { %146 = vadd.xlane.f32.xlu1 %v145_v34  ;;  %v131_v35 = vpop.xlane.xlu0 %130 }
 0x11e   :  { %v140_v36 = vmul.f32 %v138_v29, %v131_v35 }
 0x120   :  { %v142_v37 = vsub.f32 %v125_v21, %v140_v36 }
 0x122   :  { %v144_v38 = vmul.f32 %v142_v37, %v142_v37 }
 0x124   :  { %v148_v39 = vsel %vm44_vm0, %v144_v38, 0.0 }
 0x125   :  { %149 = vadd.xlane.f32.xlu1 %v148_v39 }
 0x190   :  { %v147_v40 = vpop.xlane.xlu1 %146 }
 0x191   :  { %v151_v41 = vmul.f32 %v147_v40, %v138_v29 }
 0x193   :  { %v153_v42 = vadd.f32 1e-12, %v151_v41 }
 0x195   :  { %232 = vrsqrt.f32 %v153_v42  ;;  %vm161_vm4 = vweird.f32 %v153_v42 }
 0x198   :  { %v150_v43 = vpop.xlane.xlu1 %149 }
 0x199   :  { %v152_v44 = vmul.f32 %v150_v43, %v138_v29 }
 0x19b   :  { %v233_v45 = vpop.eup %232  ;;  %v154_v46 = vadd.f32 1e-12, %v152_v44 }
 0x19c   :  { %v156_v47 = vmul.f32 %v233_v45, %v153_v42  ;;  %vm162_vm3 = vweird.f32 %v233_v45 }
 0x19d   :  { %234 = vrsqrt.f32 %v154_v46  ;;  %vm163_vm5 = vmor %vm161_vm4, %vm162_vm3  ;;  %vm171_vm7 = vweird.f32 %v154_v46 }
 0x19e   :  { %v157_v48 = vmul.f32 %v233_v45, %v156_v47 }
 0x1a0   :  { %v158_v49 = vmul.f32 0.5, %v157_v48 }
 0x1a2   :  { %v159_v50 = vsub.f32 1.5, %v158_v49 }
 0x1a3   :  { %v235_v51 = vpop.eup %234 }
 0x1a4   :  { %v160_v52 = vmul.f32 %v233_v45, %v159_v50  ;;  %v166_v53 = vmul.f32 %v235_v51, %v154_v46  ;;  %vm172_vm6 = vweird.f32 %v235_v51 }
 0x1a5   :  { %vm173_vm8 = vmor %vm171_vm7, %vm172_vm6 }
 0x1a6   :  { %v164_v55 = vsel %vm163_vm5, %v233_v45, %v160_v52  ;;  %v167_v56 = vmul.f32 %v235_v51, %v166_v53 }
 0x1a7   :  { %v175_v58 = vmul.f32 %v164_v55, %v141_v32 }
 0x1a8   :  { %v168_v59 = vmul.f32 0.5, %v167_v56 }
 0x1a9   :  { %v181_v60 = vmul.f32 %v228_v54, %v175_v58 }
 0x1aa   :  { %v169_v61 = vsub.f32 1.5, %v168_v59 }
 0x1ab   :  { %v187_v62 = vadd.f32 %v229_v57, %v181_v60 }
 0x1ac   :  { %v170_v63 = vmul.f32 %v235_v51, %v169_v61 }
 0x1ad   :  { %189 = vst.msk [vmem:[%s345_s6] sm:$0xff] %vm44_vm0, %v187_v62 }
 0x1ae   :  { %v174_v0 = vsel %vm173_vm8, %v235_v51, %v170_v63 }
 0x1af   :  { %v176_v1 = vmul.f32 %v174_v0, %v142_v37 }
 0x1b1   :  { %v182_v2 = vmul.f32 %v228_v54, %v176_v1 }
 0x1b3   :  { %v188_v3 = vadd.f32 %v229_v57, %v182_v2 }
 0x1b5   :  { %190 = vst.msk [vmem:[%s345_s6 + $0x8] sm:$0xff] %vm44_vm0, %v188_v3 }
 0x1b6   :  { %195 = vsyncpa [#allocation4], 1 }

</bundles_post_ra>
